<compile_context>
chip_gen: v7x
topology: tpu7x:2x2x1
jax: 0.10.0
libtpu: 0.0.40
codegen_flags: <defaults>
</compile_context>

<pallas_src>
import numpy as np
import jax
import jax.numpy as jnp
from jax import lax
from jax.experimental import pallas as pl
from jax.experimental.pallas import tpu as pltpu

# ----------------------- static hyper-parameters (small config) ---------------
IN_CH = 1
C1, C2, C3 = 16, 32, 64                                   # conv output channels
NCLS = 8
NCLS_PAD = 128                                            # lane-dense FC output
IMG = 16                                                  # small img_dim
# TODO(synk): the module's img_dim=224 default needs a tiled conv formulation; the
# one-hot-gather approach below is specialized to the small 16x16 config.
H0, H1, H2, H3 = IMG, IMG // 2, IMG // 4, IMG // 8        # 16, 8, 4, 2
S0, S1, S2, S3 = H0 * H0, H1 * H1, H2 * H2, H3 * H3       # 256, 64, 16, 4
NP1, NP2, NP3 = 4 * S1, 4 * S2, 4 * S3                    # conv positions fed to each pool


def _gather_onehot(in_hw):
    """One-hot gather for a fused conv(k=2,s=1,p=1) + maxpool(2,2,floor).

    Row ordering: row = t*npatch + (wr*2+wc)*pooled^2 + pi*pooled + pj with
    tap t = di*2+dj.  So the 4 taps are contiguous row blocks of size npatch and
    the 2x2 max-pool is an elementwise max of 4 contiguous blocks.
    Rows whose tap falls in the zero padding stay all-zero.
    """
    pooled = in_hw // 2
    npatch = 4 * pooled * pooled
    sel = np.zeros((4 * npatch, in_hw * in_hw), np.float32)
    for di in range(2):
        for dj in range(2):
            t = di * 2 + dj
            for wr in range(2):
                for wc in range(2):
                    for pi in range(pooled):
                        for pj in range(pooled):
                            n = (wr * 2 + wc) * pooled * pooled + pi * pooled + pj
                            si = 2 * pi + wr + di - 1
                            sj = 2 * pj + wc + dj - 1
                            if 0 <= si < in_hw and 0 <= sj < in_hw:
                                sel[t * npatch + n, si * in_hw + sj] = 1.0
    return sel


# conv1 gather with taps folded into the contraction dim AND pre-transposed so the kernel
# computes z1^T = xw^T @ SEL1T with M = C1 = 16:  SEL1T[t*S0+m, n] = stacked[t*NP1+n, m]
_SEL1_STACKED = _gather_onehot(H0)                         # (4*NP1, S0)
SEL1T = np.ascontiguousarray(
    _SEL1_STACKED.reshape(4, NP1, S0).transpose(0, 2, 1).reshape(4 * S0, NP1))
SEL2 = _gather_onehot(H1)                                  # (4*NP2, S1) = (256, 64)
SEL3 = _gather_onehot(H2)                                  # (4*NP3, S2) = (64, 16)


# ------------------------------ Pallas kernel ---------------------------------
def _pool4(z, s):
    """2x2 max-pool over pool-window-major rows: max of 4 contiguous row blocks."""
    return jnp.maximum(jnp.maximum(z[0:s], z[s:2 * s]),
                       jnp.maximum(z[2 * s:3 * s], z[3 * s:4 * s]))


def cnn31_kernel(x_ref, sel1t_ref, w1t_ref, b1t_ref,
                 sel2_ref, w2_ref, b2_ref,
                 sel3_ref, w3_ref, b3_ref,
                 wf_ref, bf_ref, o_ref, zbuf):
    f32 = jnp.float32

    # ---- conv1 (transposed: channels on sublanes) + bias + ReLU + pool1 ----
    # z1t[co, n] = sum_{t,m} w1[co,t] * x[m] * SEL1T[t*S0+m, n]
    x_row = x_ref[0]                                                    # (1, S0) lane-dense
    xwt = jnp.concatenate(
        [w1t_ref[:, t:t + 1] * x_row for t in range(4)], axis=1)        # (C1, 4*S0)  VPU
    z1t = jnp.dot(xwt, sel1t_ref[...].astype(f32),
                  preferred_element_type=f32)                           # (C1, NP1), M=16
    z1t = jnp.maximum(z1t + b1t_ref[...], 0.0)
    # pool1: columns are [win0 | win1 | win2 | win3], each S1 lanes wide
    m01 = jnp.maximum(z1t[:, :2 * S1], z1t[:, 2 * S1:])                 # (C1, 2*S1)
    f1t = jnp.maximum(m01[:, :S1], m01[:, S1:])                         # (C1, S1) = (16, 64)

    # ---- conv2 + bias + ReLU + pool2 (original row-major orientation) ----
    # f1 = f1t.T is folded into the gather dot (jnp.dot(A, B.T) pattern).
    g2 = jnp.dot(sel2_ref[...].astype(f32), f1t.T,
                 preferred_element_type=f32)                            # (4*NP2, C1)
    p2 = jnp.concatenate([g2[0:NP2], g2[NP2:2 * NP2],
                          g2[2 * NP2:3 * NP2], g2[3 * NP2:4 * NP2]], axis=1)  # (NP2, 4*C1)
    z2 = jnp.dot(p2, w2_ref[...], preferred_element_type=f32) + b2_ref[...]
    z2 = jnp.maximum(z2, 0.0)                                           # (NP2, C2)
    f2 = _pool4(z2, S2)                                                 # (S2, C2)

    # ---- conv3 + bias + ReLU ----
    g3 = jnp.dot(sel3_ref[...].astype(f32), f2,
                 preferred_element_type=f32)                            # (4*NP3, C2)
    p3 = jnp.concatenate([g3[0:NP3], g3[NP3:2 * NP3],
                          g3[2 * NP3:3 * NP3], g3[3 * NP3:4 * NP3]], axis=1)  # (NP3, 4*C2)
    z3 = jnp.dot(p3, w3_ref[...], preferred_element_type=f32) + b3_ref[...]
    z3 = jnp.maximum(z3, 0.0)                                           # (NP3, C3) = (16, 64)

    # ---- pool3 + flatten + FC fused ----
    # logits = bf + sum_s (max_w z3[w*S3+s, :]) @ Wf_s  — 4 tiny accumulated dots against
    # row blocks of the pre-permuted FC weight; no relayout, no lane concat.
    zbuf[...] = z3
    acc = bf_ref[...]                                                   # (1, NCLS_PAD)
    for s in range(S3):                                                 # unrolled, S3 = 4
        r = jnp.maximum(
            jnp.maximum(zbuf[pl.ds(s, 1), :], zbuf[pl.ds(s + S3, 1), :]),
            jnp.maximum(zbuf[pl.ds(s + 2 * S3, 1), :], zbuf[pl.ds(s + 3 * S3, 1), :]))
        acc = acc + jnp.dot(r, wf_ref[pl.ds(s * C3, C3), :],
                            preferred_element_type=f32)
    o_ref[0] = acc


# -------------------------------- wrappers --------------------------------------
def prepare_params(wc1, bc1, wc2, bc2, wc3, bc3, wf, bf):
    """One-time packing of weights / gather matrices (hoisted out of the hot path)."""
    w1t = wc1.reshape(C1, 4).astype(jnp.float32)                        # (C1, 4): tap t = di*2+dj
    b1t = bc1.reshape(C1, 1).astype(jnp.float32)
    w2m = wc2.transpose(2, 3, 1, 0).reshape(4 * C1, C2).astype(jnp.float32)
    b2 = bc2.reshape(1, C2).astype(jnp.float32)
    w3m = wc3.transpose(2, 3, 1, 0).reshape(4 * C2, C3).astype(jnp.float32)
    b3 = bc3.reshape(1, C3).astype(jnp.float32)
    # FC weight permuted to the (spatial-major, channel-minor) flatten order used by the
    # kernel epilogue, and class-padded to 128 lanes.
    wfm = wf.reshape(NCLS, C3, S3).transpose(2, 1, 0).reshape(S3 * C3, NCLS)
    wfm = jnp.pad(wfm, ((0, 0), (0, NCLS_PAD - NCLS))).astype(jnp.float32)
    bfp = jnp.pad(bf, (0, NCLS_PAD - NCLS)).reshape(1, NCLS_PAD).astype(jnp.float32)
    # 0/1 gather matrices are exact in bf16 -> halve the dominant constant DMA.
    sel1t = jnp.asarray(SEL1T, dtype=jnp.bfloat16)
    sel2 = jnp.asarray(SEL2, dtype=jnp.bfloat16)
    sel3 = jnp.asarray(SEL3, dtype=jnp.bfloat16)
    return (sel1t, w1t, b1t, sel2, w2m, b2, sel3, w3m, b3, wfm, bfp)


def cnn31_forward(x, params):
    """x: (B, 1, IMG, IMG) float32 NCHW.  Returns (B, NCLS) logits."""
    sel1t, w1t, b1t, sel2, w2m, b2, sel3, w3m, b3, wfm, bfp = params
    B = x.shape[0]
    x2 = x.reshape(B, 1, S0).astype(jnp.float32)                        # lane-dense image rows

    out = pl.pallas_call(
        cnn31_kernel,
        out_shape=jax.ShapeDtypeStruct((B, 1, NCLS_PAD), jnp.float32),
        grid=(B,),
        in_specs=[
            pl.BlockSpec((1, 1, S0), lambda b: (b, 0, 0)),              # image row
            pl.BlockSpec((4 * S0, NP1), lambda b: (0, 0)),              # sel1^T (bf16)
            pl.BlockSpec((C1, 4), lambda b: (0, 0)),                    # conv1 taps
            pl.BlockSpec((C1, 1), lambda b: (0, 0)),                    # conv1 bias (column)
            pl.BlockSpec((4 * NP2, S1), lambda b: (0, 0)),              # sel2 (bf16)
            pl.BlockSpec((4 * C1, C2), lambda b: (0, 0)),               # conv2 im2col weight
            pl.BlockSpec((1, C2), lambda b: (0, 0)),
            pl.BlockSpec((4 * NP3, S2), lambda b: (0, 0)),              # sel3 (bf16)
            pl.BlockSpec((4 * C2, C3), lambda b: (0, 0)),               # conv3 im2col weight
            pl.BlockSpec((1, C3), lambda b: (0, 0)),
            pl.BlockSpec((S3 * C3, NCLS_PAD), lambda b: (0, 0)),        # fc weight (padded)
            pl.BlockSpec((1, NCLS_PAD), lambda b: (0, 0)),
        ],
        out_specs=pl.BlockSpec((1, 1, NCLS_PAD), lambda b: (b, 0, 0)),
        scratch_shapes=[pltpu.VMEM((NP3, C3), jnp.float32)],
        compiler_params=pltpu.CompilerParams(dimension_semantics=("parallel",)),
    )(x2, sel1t, w1t, b1t, sel2, w2m, b2, sel3, w3m, b3, wfm, bfp)

    return out[:, 0, :NCLS]


# ------------------------------ pure-JAX reference -----------------------------
def _reference(x, wc1, bc1, wc2, bc2, wc3, bc3, wf, bf):
    P = lax.Precision.HIGHEST

    def conv_relu(h, w, b):
        y = lax.conv_general_dilated(h, w, (1, 1), ((1, 1), (1, 1)),
                                     dimension_numbers=("NCHW", "OIHW", "NCHW"),
                                     precision=P)
        return jnp.maximum(y + b.reshape(1, -1, 1, 1), 0.0)

    def pool(h):
        return lax.reduce_window(h, -jnp.inf, lax.max,
                                 (1, 1, 2, 2), (1, 1, 2, 2), "VALID")

    h = pool(conv_relu(x, wc1, bc1))
    h = pool(conv_relu(h, wc2, bc2))
    h = pool(conv_relu(h, wc3, bc3))
    flat = h.reshape(h.shape[0], -1)
    return jnp.dot(flat, wf.T, precision=P) + bf


# ---------------------------------- main ----------------------------------------
if __name__ == "__main__":
    key = jax.random.PRNGKey(0)
    ks = jax.random.split(key, 9)
    B = 2
    x   = jax.random.normal(ks[0], (B, IN_CH, IMG, IMG), jnp.float32)
    wc1 = jax.random.normal(ks[1], (C1, IN_CH, 2, 2), jnp.float32) * 0.5
    bc1 = jax.random.normal(ks[2], (C1,), jnp.float32) * 0.1
    wc2 = jax.random.normal(ks[3], (C2, C1, 2, 2), jnp.float32) * 0.15
    bc2 = jax.random.normal(ks[4], (C2,), jnp.float32) * 0.1
    wc3 = jax.random.normal(ks[5], (C3, C2, 2, 2), jnp.float32) * 0.1
    bc3 = jax.random.normal(ks[6], (C3,), jnp.float32) * 0.1
    wf  = jax.random.normal(ks[7], (NCLS, C3 * S3), jnp.float32) * 0.05
    bf  = jax.random.normal(ks[8], (NCLS,), jnp.float32) * 0.1

    # one-time parameter packing (hoisted out of the per-call hot path)
    params = prepare_params(wc1, bc1, wc2, bc2, wc3, bc3, wf, bf)
    params = jax.block_until_ready(params)

    fwd = jax.jit(cnn31_forward)
    out = jax.block_until_ready(fwd(x, params))
    ref = _reference(x, wc1, bc1, wc2, bc2, wc3, bc3, wf, bf)

    assert out.shape == (B, NCLS)
    assert jnp.allclose(out, ref, atol=1e-3, rtol=1e-3), (
        "max abs err = %g" % float(jnp.max(jnp.abs(out - ref))))
    print("KERNEL_OK")
</pallas_src>

<mosaic_0001>
module attributes {stable_mosaic.version = 11 : i64} {
  func.func @cnn31_kernel(%arg0: i32, %arg1: memref<1x1x256xf32, #tpu.memory_space<vmem>>, %arg2: memref<1024x256xbf16, #tpu.memory_space<vmem>>, %arg3: memref<16x4xf32, #tpu.memory_space<vmem>>, %arg4: memref<16x1xf32, #tpu.memory_space<vmem>>, %arg5: memref<256x64xbf16, #tpu.memory_space<vmem>>, %arg6: memref<64x32xf32, #tpu.memory_space<vmem>>, %arg7: memref<1x32xf32, #tpu.memory_space<vmem>>, %arg8: memref<64x16xbf16, #tpu.memory_space<vmem>>, %arg9: memref<128x64xf32, #tpu.memory_space<vmem>>, %arg10: memref<1x64xf32, #tpu.memory_space<vmem>>, %arg11: memref<256x128xf32, #tpu.memory_space<vmem>>, %arg12: memref<1x128xf32, #tpu.memory_space<vmem>>, %arg13: memref<1x1x128xf32, #tpu.memory_space<vmem>>, %arg14: memref<16x64xf32, #tpu.memory_space<vmem>>) attributes {dimension_semantics = [#tpu.dimension_semantics<parallel>], iteration_bounds = array<i64: 2>, scalar_prefetch = 0 : i64, scratch_operands = 1 : i64, tpu.core_type = #tpu.core_type<tc>, window_params = [{transform_indices = @transform_0, window_bounds = array<i64: 1, 1, 256>}, {pipeline_mode = #tpu.pipeline_mode<synchronous>, transform_indices = @transform_1, window_bounds = array<i64: 1024, 256>}, {pipeline_mode = #tpu.pipeline_mode<synchronous>, transform_indices = @transform_2, window_bounds = array<i64: 16, 4>}, {pipeline_mode = #tpu.pipeline_mode<synchronous>, transform_indices = @transform_3, window_bounds = array<i64: 16, 1>}, {pipeline_mode = #tpu.pipeline_mode<synchronous>, transform_indices = @transform_4, window_bounds = array<i64: 256, 64>}, {pipeline_mode = #tpu.pipeline_mode<synchronous>, transform_indices = @transform_5, window_bounds = array<i64: 64, 32>}, {pipeline_mode = #tpu.pipeline_mode<synchronous>, transform_indices = @transform_6, window_bounds = array<i64: 1, 32>}, {pipeline_mode = #tpu.pipeline_mode<synchronous>, transform_indices = @transform_7, window_bounds = array<i64: 64, 16>}, {pipeline_mode = #tpu.pipeline_mode<synchronous>, transform_indices = @transform_8, window_bounds = array<i64: 128, 64>}, {pipeline_mode = #tpu.pipeline_mode<synchronous>, transform_indices = @transform_9, window_bounds = array<i64: 1, 64>}, {pipeline_mode = #tpu.pipeline_mode<synchronous>, transform_indices = @transform_10, window_bounds = array<i64: 256, 128>}, {pipeline_mode = #tpu.pipeline_mode<synchronous>, transform_indices = @transform_11, window_bounds = array<i64: 1, 128>}, {transform_indices = @transform_12, window_bounds = array<i64: 1, 1, 128>}]} {
    %c0 = arith.constant 0 : index
    %c0_0 = arith.constant 0 : index
    %c0_1 = arith.constant 0 : index
    %0 = vector.load %arg1[%c0, %c0_0, %c0_1] : memref<1x1x256xf32, #tpu.memory_space<vmem>>, vector<1x1x256xf32>
    %1 = vector.shape_cast %0 : vector<1x1x256xf32> to vector<1x256xf32>
    %c0_2 = arith.constant 0 : index
    %c0_3 = arith.constant 0 : index
    %2 = vector.load %arg3[%c0_2, %c0_3] : memref<16x4xf32, #tpu.memory_space<vmem>>, vector<16x1xf32>
    %3 = vector.broadcast %2 : vector<16x1xf32> to vector<16x256xf32>
    %4 = vector.broadcast %1 : vector<1x256xf32> to vector<16x256xf32>
    %5 = arith.mulf %3, %4 : vector<16x256xf32>
    %c0_4 = arith.constant 0 : index
    %c1 = arith.constant 1 : index
    %6 = vector.load %arg3[%c0_4, %c1] : memref<16x4xf32, #tpu.memory_space<vmem>>, vector<16x1xf32>
    %7 = vector.broadcast %6 : vector<16x1xf32> to vector<16x256xf32>
    %8 = vector.broadcast %1 : vector<1x256xf32> to vector<16x256xf32>
    %9 = arith.mulf %7, %8 : vector<16x256xf32>
    %c0_5 = arith.constant 0 : index
    %c2 = arith.constant 2 : index
    %10 = vector.load %arg3[%c0_5, %c2] : memref<16x4xf32, #tpu.memory_space<vmem>>, vector<16x1xf32>
    %11 = vector.broadcast %10 : vector<16x1xf32> to vector<16x256xf32>
    %12 = vector.broadcast %1 : vector<1x256xf32> to vector<16x256xf32>
    %13 = arith.mulf %11, %12 : vector<16x256xf32>
    %c0_6 = arith.constant 0 : index
    %c3 = arith.constant 3 : index
    %14 = vector.load %arg3[%c0_6, %c3] : memref<16x4xf32, #tpu.memory_space<vmem>>, vector<16x1xf32>
    %15 = vector.broadcast %14 : vector<16x1xf32> to vector<16x256xf32>
    %16 = vector.broadcast %1 : vector<1x256xf32> to vector<16x256xf32>
    %17 = arith.mulf %15, %16 : vector<16x256xf32>
    %18 = tpu.concatenate %5, %9, %13, %17 in 1 : vector<16x256xf32>, vector<16x256xf32>, vector<16x256xf32>, vector<16x256xf32> -> vector<16x1024xf32>
    %c0_7 = arith.constant 0 : index
    %c0_8 = arith.constant 0 : index
    %19 = vector.load %arg2[%c0_7, %c0_8] : memref<1024x256xbf16, #tpu.memory_space<vmem>>, vector<1024x256xbf16>
    %20 = arith.extf %19 : vector<1024x256xbf16> to vector<1024x256xf32>
    %cst = arith.constant dense<0.000000e+00> : vector<16x256xf32>
    %21 = tpu.matmul %18, %20, %cst {dimension_numbers = #tpu.dot_dimension_numbers<[1], [0], [0], [1], [0, 0, 1, 1], [], []>} : vector<16x1024xf32>, vector<1024x256xf32>, vector<16x256xf32> -> vector<16x256xf32>
    %c0_9 = arith.constant 0 : index
    %c0_10 = arith.constant 0 : index
    %22 = vector.load %arg4[%c0_9, %c0_10] : memref<16x1xf32, #tpu.memory_space<vmem>>, vector<16x1xf32>
    %23 = vector.broadcast %22 : vector<16x1xf32> to vector<16x256xf32>
    %24 = arith.addf %21, %23 : vector<16x256xf32>
    %cst_11 = arith.constant 0.000000e+00 : f32
    %25 = vector.broadcast %cst_11 : f32 to vector<16x256xf32>
    %26 = arith.maximumf %24, %25 : vector<16x256xf32>
    %27 = vector.extract_strided_slice %26 {offsets = [0, 0], sizes = [16, 128], strides = [1, 1]} : vector<16x256xf32> to vector<16x128xf32>
    %28 = vector.extract_strided_slice %26 {offsets = [0, 128], sizes = [16, 128], strides = [1, 1]} : vector<16x256xf32> to vector<16x128xf32>
    %29 = arith.maximumf %27, %28 : vector<16x128xf32>
    %30 = vector.extract_strided_slice %29 {offsets = [0, 0], sizes = [16, 64], strides = [1, 1]} : vector<16x128xf32> to vector<16x64xf32>
    %31 = vector.extract_strided_slice %29 {offsets = [0, 64], sizes = [16, 64], strides = [1, 1]} : vector<16x128xf32> to vector<16x64xf32>
    %32 = arith.maximumf %30, %31 : vector<16x64xf32>
    %c0_12 = arith.constant 0 : index
    %c0_13 = arith.constant 0 : index
    %33 = vector.load %arg5[%c0_12, %c0_13] : memref<256x64xbf16, #tpu.memory_space<vmem>>, vector<256x64xbf16>
    %34 = arith.extf %33 : vector<256x64xbf16> to vector<256x64xf32>
    %35 = tpu.transpose %32, [1, 0] : vector<16x64xf32> -> vector<64x16xf32>
    %cst_14 = arith.constant dense<0.000000e+00> : vector<256x16xf32>
    %36 = tpu.matmul %34, %35, %cst_14 {dimension_numbers = #tpu.dot_dimension_numbers<[1], [0], [0], [1], [0, 0, 1, 1], [], []>} : vector<256x64xf32>, vector<64x16xf32>, vector<256x16xf32> -> vector<256x16xf32>
    %37 = vector.extract_strided_slice %36 {offsets = [0, 0], sizes = [64, 16], strides = [1, 1]} : vector<256x16xf32> to vector<64x16xf32>
    %38 = vector.extract_strided_slice %36 {offsets = [64, 0], sizes = [64, 16], strides = [1, 1]} : vector<256x16xf32> to vector<64x16xf32>
    %39 = vector.extract_strided_slice %36 {offsets = [128, 0], sizes = [64, 16], strides = [1, 1]} : vector<256x16xf32> to vector<64x16xf32>
    %40 = vector.extract_strided_slice %36 {offsets = [192, 0], sizes = [64, 16], strides = [1, 1]} : vector<256x16xf32> to vector<64x16xf32>
    %41 = tpu.concatenate %37, %38, %39, %40 in 1 : vector<64x16xf32>, vector<64x16xf32>, vector<64x16xf32>, vector<64x16xf32> -> vector<64x64xf32>
    %c0_15 = arith.constant 0 : index
    %c0_16 = arith.constant 0 : index
    %42 = vector.load %arg6[%c0_15, %c0_16] : memref<64x32xf32, #tpu.memory_space<vmem>>, vector<64x32xf32>
    %cst_17 = arith.constant dense<0.000000e+00> : vector<64x32xf32>
    %43 = tpu.matmul %41, %42, %cst_17 {dimension_numbers = #tpu.dot_dimension_numbers<[1], [0], [0], [1], [0, 0, 1, 1], [], []>} : vector<64x64xf32>, vector<64x32xf32>, vector<64x32xf32> -> vector<64x32xf32>
    %c0_18 = arith.constant 0 : index
    %c0_19 = arith.constant 0 : index
    %44 = vector.load %arg7[%c0_18, %c0_19] : memref<1x32xf32, #tpu.memory_space<vmem>>, vector<1x32xf32>
    %45 = vector.broadcast %44 : vector<1x32xf32> to vector<64x32xf32>
    %46 = arith.addf %43, %45 : vector<64x32xf32>
    %cst_20 = arith.constant 0.000000e+00 : f32
    %47 = vector.broadcast %cst_20 : f32 to vector<64x32xf32>
    %48 = arith.maximumf %46, %47 : vector<64x32xf32>
    %49 = vector.extract_strided_slice %48 {offsets = [0, 0], sizes = [16, 32], strides = [1, 1]} : vector<64x32xf32> to vector<16x32xf32>
    %50 = vector.extract_strided_slice %48 {offsets = [16, 0], sizes = [16, 32], strides = [1, 1]} : vector<64x32xf32> to vector<16x32xf32>
    %51 = arith.maximumf %49, %50 : vector<16x32xf32>
    %52 = vector.extract_strided_slice %48 {offsets = [32, 0], sizes = [16, 32], strides = [1, 1]} : vector<64x32xf32> to vector<16x32xf32>
    %53 = vector.extract_strided_slice %48 {offsets = [48, 0], sizes = [16, 32], strides = [1, 1]} : vector<64x32xf32> to vector<16x32xf32>
    %54 = arith.maximumf %52, %53 : vector<16x32xf32>
    %55 = arith.maximumf %51, %54 : vector<16x32xf32>
    %c0_21 = arith.constant 0 : index
    %c0_22 = arith.constant 0 : index
    %56 = vector.load %arg8[%c0_21, %c0_22] : memref<64x16xbf16, #tpu.memory_space<vmem>>, vector<64x16xbf16>
    %57 = arith.extf %56 : vector<64x16xbf16> to vector<64x16xf32>
    %cst_23 = arith.constant dense<0.000000e+00> : vector<64x32xf32>
    %58 = tpu.matmul %57, %55, %cst_23 {dimension_numbers = #tpu.dot_dimension_numbers<[1], [0], [0], [1], [0, 0, 1, 1], [], []>} : vector<64x16xf32>, vector<16x32xf32>, vector<64x32xf32> -> vector<64x32xf32>
    %59 = vector.extract_strided_slice %58 {offsets = [0, 0], sizes = [16, 32], strides = [1, 1]} : vector<64x32xf32> to vector<16x32xf32>
    %60 = vector.extract_strided_slice %58 {offsets = [16, 0], sizes = [16, 32], strides = [1, 1]} : vector<64x32xf32> to vector<16x32xf32>
    %61 = vector.extract_strided_slice %58 {offsets = [32, 0], sizes = [16, 32], strides = [1, 1]} : vector<64x32xf32> to vector<16x32xf32>
    %62 = vector.extract_strided_slice %58 {offsets = [48, 0], sizes = [16, 32], strides = [1, 1]} : vector<64x32xf32> to vector<16x32xf32>
    %63 = tpu.concatenate %59, %60, %61, %62 in 1 : vector<16x32xf32>, vector<16x32xf32>, vector<16x32xf32>, vector<16x32xf32> -> vector<16x128xf32>
    %c0_24 = arith.constant 0 : index
    %c0_25 = arith.constant 0 : index
    %64 = vector.load %arg9[%c0_24, %c0_25] : memref<128x64xf32, #tpu.memory_space<vmem>>, vector<128x64xf32>
    %cst_26 = arith.constant dense<0.000000e+00> : vector<16x64xf32>
    %65 = tpu.matmul %63, %64, %cst_26 {dimension_numbers = #tpu.dot_dimension_numbers<[1], [0], [0], [1], [0, 0, 1, 1], [], []>} : vector<16x128xf32>, vector<128x64xf32>, vector<16x64xf32> -> vector<16x64xf32>
    %c0_27 = arith.constant 0 : index
    %c0_28 = arith.constant 0 : index
    %66 = vector.load %arg10[%c0_27, %c0_28] : memref<1x64xf32, #tpu.memory_space<vmem>>, vector<1x64xf32>
    %67 = vector.broadcast %66 : vector<1x64xf32> to vector<16x64xf32>
    %68 = arith.addf %65, %67 : vector<16x64xf32>
    %cst_29 = arith.constant 0.000000e+00 : f32
    %69 = vector.broadcast %cst_29 : f32 to vector<16x64xf32>
    %70 = arith.maximumf %68, %69 : vector<16x64xf32>
    %c0_30 = arith.constant 0 : index
    %c0_31 = arith.constant 0 : index
    %71 = vector.load %arg14[%c0_30, %c0_31] : memref<16x64xf32, #tpu.memory_space<vmem>>, vector<16x64xf32>
    tpu.vector_store %arg14[%c0_30, %c0_31], %70 {strides = array<i32>} : memref<16x64xf32, #tpu.memory_space<vmem>>, vector<16x64xf32>,
    %c0_32 = arith.constant 0 : index
    %c0_33 = arith.constant 0 : index
    %72 = vector.load %arg12[%c0_32, %c0_33] : memref<1x128xf32, #tpu.memory_space<vmem>>, vector<1x128xf32>
    %c0_34 = arith.constant 0 : index
    %c0_35 = arith.constant 0 : index
    %73 = vector.load %arg14[%c0_34, %c0_35] : memref<16x64xf32, #tpu.memory_space<vmem>>, vector<1x64xf32>
    %c4 = arith.constant 4 : index
    %c0_36 = arith.constant 0 : index
    %74 = vector.load %arg14[%c4, %c0_36] : memref<16x64xf32, #tpu.memory_space<vmem>>, vector<1x64xf32>
    %75 = arith.maximumf %73, %74 : vector<1x64xf32>
    %c8 = arith.constant 8 : index
    %c0_37 = arith.constant 0 : index
    %76 = vector.load %arg14[%c8, %c0_37] : memref<16x64xf32, #tpu.memory_space<vmem>>, vector<1x64xf32>
    %c12 = arith.constant 12 : index
    %c0_38 = arith.constant 0 : index
    %77 = vector.load %arg14[%c12, %c0_38] : memref<16x64xf32, #tpu.memory_space<vmem>>, vector<1x64xf32>
    %78 = arith.maximumf %76, %77 : vector<1x64xf32>
    %79 = arith.maximumf %75, %78 : vector<1x64xf32>
    %c0_39 = arith.constant 0 : index
    %c0_40 = arith.constant 0 : index
    %80 = vector.load %arg11[%c0_39, %c0_40] : memref<256x128xf32, #tpu.memory_space<vmem>>, vector<64x128xf32>
    %cst_41 = arith.constant dense<0.000000e+00> : vector<1x128xf32>
    %81 = tpu.matmul %79, %80, %cst_41 {dimension_numbers = #tpu.dot_dimension_numbers<[1], [0], [0], [1], [0, 0, 1, 1], [], []>} : vector<1x64xf32>, vector<64x128xf32>, vector<1x128xf32> -> vector<1x128xf32>
    %82 = arith.addf %72, %81 : vector<1x128xf32>
    %c1_42 = arith.constant 1 : index
    %c0_43 = arith.constant 0 : index
    %83 = vector.load %arg14[%c1_42, %c0_43] : memref<16x64xf32, #tpu.memory_space<vmem>>, vector<1x64xf32>
    %c5 = arith.constant 5 : index
    %c0_44 = arith.constant 0 : index
    %84 = vector.load %arg14[%c5, %c0_44] : memref<16x64xf32, #tpu.memory_space<vmem>>, vector<1x64xf32>
    %85 = arith.maximumf %83, %84 : vector<1x64xf32>
    %c9 = arith.constant 9 : index
    %c0_45 = arith.constant 0 : index
    %86 = vector.load %arg14[%c9, %c0_45] : memref<16x64xf32, #tpu.memory_space<vmem>>, vector<1x64xf32>
    %c13 = arith.constant 13 : index
    %c0_46 = arith.constant 0 : index
    %87 = vector.load %arg14[%c13, %c0_46] : memref<16x64xf32, #tpu.memory_space<vmem>>, vector<1x64xf32>
    %88 = arith.maximumf %86, %87 : vector<1x64xf32>
    %89 = arith.maximumf %85, %88 : vector<1x64xf32>
    %c64 = arith.constant 64 : index
    %c0_47 = arith.constant 0 : index
    %90 = vector.load %arg11[%c64, %c0_47] : memref<256x128xf32, #tpu.memory_space<vmem>>, vector<64x128xf32>
    %cst_48 = arith.constant dense<0.000000e+00> : vector<1x128xf32>
    %91 = tpu.matmul %89, %90, %cst_48 {dimension_numbers = #tpu.dot_dimension_numbers<[1], [0], [0], [1], [0, 0, 1, 1], [], []>} : vector<1x64xf32>, vector<64x128xf32>, vector<1x128xf32> -> vector<1x128xf32>
    %92 = arith.addf %82, %91 : vector<1x128xf32>
    %c2_49 = arith.constant 2 : index
    %c0_50 = arith.constant 0 : index
    %93 = vector.load %arg14[%c2_49, %c0_50] : memref<16x64xf32, #tpu.memory_space<vmem>>, vector<1x64xf32>
    %c6 = arith.constant 6 : index
    %c0_51 = arith.constant 0 : index
    %94 = vector.load %arg14[%c6, %c0_51] : memref<16x64xf32, #tpu.memory_space<vmem>>, vector<1x64xf32>
    %95 = arith.maximumf %93, %94 : vector<1x64xf32>
    %c10 = arith.constant 10 : index
    %c0_52 = arith.constant 0 : index
    %96 = vector.load %arg14[%c10, %c0_52] : memref<16x64xf32, #tpu.memory_space<vmem>>, vector<1x64xf32>
    %c14 = arith.constant 14 : index
    %c0_53 = arith.constant 0 : index
    %97 = vector.load %arg14[%c14, %c0_53] : memref<16x64xf32, #tpu.memory_space<vmem>>, vector<1x64xf32>
    %98 = arith.maximumf %96, %97 : vector<1x64xf32>
    %99 = arith.maximumf %95, %98 : vector<1x64xf32>
    %c128 = arith.constant 128 : index
    %c0_54 = arith.constant 0 : index
    %100 = vector.load %arg11[%c128, %c0_54] : memref<256x128xf32, #tpu.memory_space<vmem>>, vector<64x128xf32>
    %cst_55 = arith.constant dense<0.000000e+00> : vector<1x128xf32>
    %101 = tpu.matmul %99, %100, %cst_55 {dimension_numbers = #tpu.dot_dimension_numbers<[1], [0], [0], [1], [0, 0, 1, 1], [], []>} : vector<1x64xf32>, vector<64x128xf32>, vector<1x128xf32> -> vector<1x128xf32>
    %102 = arith.addf %92, %101 : vector<1x128xf32>
    %c3_56 = arith.constant 3 : index
    %c0_57 = arith.constant 0 : index
    %103 = vector.load %arg14[%c3_56, %c0_57] : memref<16x64xf32, #tpu.memory_space<vmem>>, vector<1x64xf32>
    %c7 = arith.constant 7 : index
    %c0_58 = arith.constant 0 : index
    %104 = vector.load %arg14[%c7, %c0_58] : memref<16x64xf32, #tpu.memory_space<vmem>>, vector<1x64xf32>
    %105 = arith.maximumf %103, %104 : vector<1x64xf32>
    %c11 = arith.constant 11 : index
    %c0_59 = arith.constant 0 : index
    %106 = vector.load %arg14[%c11, %c0_59] : memref<16x64xf32, #tpu.memory_space<vmem>>, vector<1x64xf32>
    %c15 = arith.constant 15 : index
    %c0_60 = arith.constant 0 : index
    %107 = vector.load %arg14[%c15, %c0_60] : memref<16x64xf32, #tpu.memory_space<vmem>>, vector<1x64xf32>
    %108 = arith.maximumf %106, %107 : vector<1x64xf32>
    %109 = arith.maximumf %105, %108 : vector<1x64xf32>
    %c192 = arith.constant 192 : index
    %c0_61 = arith.constant 0 : index
    %110 = vector.load %arg11[%c192, %c0_61] : memref<256x128xf32, #tpu.memory_space<vmem>>, vector<64x128xf32>
    %cst_62 = arith.constant dense<0.000000e+00> : vector<1x128xf32>
    %111 = tpu.matmul %109, %110, %cst_62 {dimension_numbers = #tpu.dot_dimension_numbers<[1], [0], [0], [1], [0, 0, 1, 1], [], []>} : vector<1x64xf32>, vector<64x128xf32>, vector<1x128xf32> -> vector<1x128xf32>
    %112 = arith.addf %102, %111 : vector<1x128xf32>
    %c0_63 = arith.constant 0 : index
    %c0_64 = arith.constant 0 : index
    %c0_65 = arith.constant 0 : index
    %113 = vector.load %arg13[%c0_63, %c0_64, %c0_65] : memref<1x1x128xf32, #tpu.memory_space<vmem>>, vector<1x1x128xf32>
    %114 = vector.shape_cast %113 : vector<1x1x128xf32> to vector<1x128xf32>
    %115 = vector.shape_cast %112 : vector<1x128xf32> to vector<1x1x128xf32>
    tpu.vector_store %arg13[%c0_63, %c0_64, %c0_65], %115 {strides = array<i32>} : memref<1x1x128xf32, #tpu.memory_space<vmem>>, vector<1x1x128xf32>,
    return
  }
  func.func @transform_0(%arg0: i32) -> (i32, i32, i32) {
    %c0_i32 = arith.constant 0 : i32
    %c0_i32_0 = arith.constant 0 : i32
    %c0_i32_1 = arith.constant 0 : i32
    return %arg0, %c0_i32, %c0_i32_0 : i32, i32, i32
  }
  func.func @transform_1(%arg0: i32) -> (i32, i32) {
    %c0_i32 = arith.constant 0 : i32
    %c0_i32_0 = arith.constant 0 : i32
    %c0_i32_1 = arith.constant 0 : i32
    return %c0_i32, %c0_i32_0 : i32, i32
  }
  func.func @transform_2(%arg0: i32) -> (i32, i32) {
    %c0_i32 = arith.constant 0 : i32
    %c0_i32_0 = arith.constant 0 : i32
    %c0_i32_1 = arith.constant 0 : i32
    return %c0_i32, %c0_i32_0 : i32, i32
  }
  func.func @transform_3(%arg0: i32) -> (i32, i32) {
    %c0_i32 = arith.constant 0 : i32
    %c0_i32_0 = arith.constant 0 : i32
    %c0_i32_1 = arith.constant 0 : i32
    return %c0_i32, %c0_i32_0 : i32, i32
  }
  func.func @transform_4(%arg0: i32) -> (i32, i32) {
    %c0_i32 = arith.constant 0 : i32
    %c0_i32_0 = arith.constant 0 : i32
    %c0_i32_1 = arith.constant 0 : i32
    return %c0_i32, %c0_i32_0 : i32, i32
  }
  func.func @transform_5(%arg0: i32) -> (i32, i32) {
    %c0_i32 = arith.constant 0 : i32
    %c0_i32_0 = arith.constant 0 : i32
    %c0_i32_1 = arith.constant 0 : i32
    return %c0_i32, %c0_i32_0 : i32, i32
  }
  func.func @transform_6(%arg0: i32) -> (i32, i32) {
    %c0_i32 = arith.constant 0 : i32
    %c0_i32_0 = arith.constant 0 : i32
    %c0_i32_1 = arith.constant 0 : i32
    return %c0_i32, %c0_i32_0 : i32, i32
  }
  func.func @transform_7(%arg0: i32) -> (i32, i32) {
    %c0_i32 = arith.constant 0 : i32
    %c0_i32_0 = arith.constant 0 : i32
    %c0_i32_1 = arith.constant 0 : i32
    return %c0_i32, %c0_i32_0 : i32, i32
  }
  func.func @transform_8(%arg0: i32) -> (i32, i32) {
    %c0_i32 = arith.constant 0 : i32
    %c0_i32_0 = arith.constant 0 : i32
    %c0_i32_1 = arith.constant 0 : i32
    return %c0_i32, %c0_i32_0 : i32, i32
  }
  func.func @transform_9(%arg0: i32) -> (i32, i32) {
    %c0_i32 = arith.constant 0 : i32
    %c0_i32_0 = arith.constant 0 : i32
    %c0_i32_1 = arith.constant 0 : i32
    return %c0_i32, %c0_i32_0 : i32, i32
  }
  func.func @transform_10(%arg0: i32) -> (i32, i32) {
    %c0_i32 = arith.constant 0 : i32
    %c0_i32_0 = arith.constant 0 : i32
    %c0_i32_1 = arith.constant 0 : i32
    return %c0_i32, %c0_i32_0 : i32, i32
  }
  func.func @transform_11(%arg0: i32) -> (i32, i32) {
    %c0_i32 = arith.constant 0 : i32
    %c0_i32_0 = arith.constant 0 : i32
    %c0_i32_1 = arith.constant 0 : i32
    return %c0_i32, %c0_i32_0 : i32, i32
  }
  func.func @transform_12(%arg0: i32) -> (i32, i32, i32) {
    %c0_i32 = arith.constant 0 : i32
    %c0_i32_0 = arith.constant 0 : i32
    %c0_i32_1 = arith.constant 0 : i32
    return %arg0, %c0_i32, %c0_i32_0 : i32, i32, i32
  }
}

</mosaic_0001>

<bundles_post_ra>
// kernel: cnn31_forward.1
= control target key start
LH: loop header
LB: loop body
LE: loop exit
PB: predicated region body
PF: predicated region fallthrough
CT: control target
= control target key end

     0   :  { %17 = vsyncpa [#allocation4], 0  ;;  %s4626_s0 = inlined_call_operand.vmem [shape: f32[2,1,256], index: 0, kind: input, shape index: {}]   ;;  %s4627_s1 = inlined_call_operand.hbm [shape: bf16[1024,256], index: 1, kind: input, shape index: {}]   ;;  %s4628_s2 = inlined_call_operand.vmem [shape: f32[16,4], index: 2, kind: input, shape index: {}]   ;;  %s4629_s3 = inlined_call_operand.vmem [shape: f32[16,1], index: 3, kind: input, shape index: {}]   ;;  %s4630_s4 = inlined_call_operand.vmem [shape: bf16[256,64], index: 4, kind: input, shape index: {}]   ;;  %s4631_s5 = inlined_call_operand.vmem [shape: f32[64,32], index: 5, kind: input, shape index: {}]   ;;  %s4632_s6 = inlined_call_operand.vmem [shape: f32[1,32], index: 6, kind: input, shape index: {}]   ;;  %s4633_s7 = inlined_call_operand.vmem [shape: bf16[64,16], index: 7, kind: input, shape index: {}]   ;;  %s4634_s8 = inlined_call_operand.vmem [shape: f32[128,64], index: 8, kind: input, shape index: {}]   ;;  %s4635_s9 = inlined_call_operand.vmem [shape: f32[1,64], index: 9, kind: input, shape index: {}]   ;;  %s4636_s10 = inlined_call_operand.vmem [shape: f32[256,128], index: 10, kind: input, shape index: {}]   ;;  %s4637_s11 = inlined_call_operand.vmem [shape: f32[1,128], index: 11, kind: input, shape index: {}]   ;;  %s4638_s12 = inlined_call_operand.hbm [shape: f32[2,1,128], index: 12, kind: output, shape index: {}]  }
   0x1   :  { %18 = vsyncpa [#allocation5], 0 }
   0x2   :  { %20 = vsyncpa [#allocation5 + $0x1], 0  ;;  %s4056_s21 = smov 0   ;;  %s4058_s22 = smov 0  }
   0x3   :  { %s4060_s23 = smov 0   ;;  %s4062_s24 = smov 0  }
   0x4 LB: > { %4644 = sst [smem:[#allocation9_spill]] %s3969_s23  ;;  %s4077_s25 = sadd.s32 4294967295, %s3973_s24   ;;  %s3973_s24 = sphi %s4062_s24, %s4660_s24   ;;  %s3969_s23 = sphi %s4060_s23, %s4657_s23   ;;  %s3965_s22 = sphi %s4058_s22, %s4659_s22   ;;  %s3961_s21 = sphi %s4056_s21, %s4658_s21  }
   0x5   : > { %s2596_s26 = sadd.s32 4294967294, %s3973_s24   ;;  %s4081_s27 = sadd.s32 1, %s3973_s24  }
   0x6   : > { %s290_s28 = sadd.s32 1, %s3969_s23  ;;  %s287_s29 = ssub.s32 %s3973_s24, %s4081_s27 }
   0x7   : > { %p300_p0 = scmp.ne.s32.totalorder %s3969_s23, %s3965_s22  ;;  %p288_p1 = scmp.eq.s32.totalorder %s287_s29, 0 }
   0x8   : > { %p301_p2 = scmp.eq.s32.totalorder %s4077_s25, 1  ;;  %p306_p3 = scmp.ne.s32.totalorder %s3965_s22, %s3961_s21 }
   0x9   : > { %p307_p4 = scmp.eq.s32.totalorder %s2596_s26, 1  ;;  %p2597_p7 = scmp.ge.s32.totalorder %s3973_s24, 1 }
   0xa   : > { %s4092_s30 = scalar_select %p288_p1, %s3969_s23, %s290_s28  }
   0xb   : > { %p4094_p5 = por %p301_p2, %p300_p0  ;;  %p4098_p6 = por %p307_p4, %p306_p3 }
   0xc   : > { %4645 = sst [smem:[#allocation10_spill]] %s4092_s30  ;;  %p314_p8 = scmp.lt.s32.totalorder %s3973_s24, 3 }
   0xd   : > { %s4646_s13 = scalar_select %p4094_p5, 1, 0 }
   0xe   : > { %s4647_s14 = scalar_select %p4098_p6, 1, 0 }
   0xf   : > { %p4640_p9 = scmp.eq.s32.totalorder %s4077_s25, 0  ;;  %p4105_p10 = pnand %p2597_p7, %p314_p8 }
  0x10   : > { %s3975_s16 = smov [#allocation3]   ;;  %s3879_s26 = scalar_lea.hbm %s4627_s1, 16384 }
  0x11   : > { %s4648_s15 = scalar_select %p4105_p10, 1, 0 }
  0x12   : > { %s326_s17 = sshll.u32 %s3975_s16, 4  ;;  %p3602_p11 = pneg %p4105_p10  ;;  %s327_s17 = int_to_ptr.vmem [resolvable:$true] %s326_s17 }
  0x13   : > { %p3880_p13 = scmp.ne.s32.totalorder %s4627_s1, %s3879_s26  ;;  %p3886_p3 = scmp.lt.u32.totalorder %s3879_s26, %s4627_s1 }
  0x14   : > { %p4113_p12 = pnand %p4640_p9, %p3602_p11 }
  0x16   : > { %p3881_p0 = pneg %p4113_p12 }
  0x18   : > { %p3882_p1 = pnand %p3881_p0, %p3880_p13 }
  0x1a   : > { %p3883_p2 = pneg %p3882_p1 }
  0x1c   : > { %p3888_p4 = pnand %p3886_p3, %p3883_p2 }
  0x1e   : > { %3891 = shalt.err (!%p3888_p4)
}
  0x1f   : > { %s3892_s23 = scalar_lea.vmem %s327_s17, 16384  ;;  %p3900_p9 = scmp.lt.s32.totalorder %s327_s17, %s327_s17 }
  0x20   : > { %p3893_p7 = scmp.ne.s32.totalorder %s327_s17, %s3892_s23  ;;  %p3901_p6 = scmp.lt.s32.totalorder %s3892_s23, %s3892_s23 }
  0x22   : > { %p3895_p8 = pnand %p3893_p7, %p3881_p0  ;;  %p3902_p5 = por %p3901_p6, %p3900_p9 }
  0x24   : > { %p3896_p11 = pneg %p3895_p8 }
  0x26   : > { %p3903_p10 = pnand %p3902_p5, %p3896_p11 }
  0x28   : > { %3906 = shalt.err (!%p3903_p10)
}
  0x29   : > { %s3976_s19 = smov 128   ;;  %s3977_s20 = smov 8  }
  0x2a   : > { %3605 = dma.hbm_to_vmem [thread:$0]  (!%p4113_p12), %s4627_s1, 16384, %s327_s17, [#allocation4], %s3976_s19, %s3976_s19, %s3977_s20  }
  0x2b   : > { %p4650_p13 = scmp.ne.s32.totalorder %s4648_s15, 0 }
  0x2c   : > { %p4651_p1 = scmp.eq.s32.totalorder (!%p4650_p13), %s4077_s25, 0 }
  0x2d   : > { %379 = sbr.rel (%p4650_p13) target bundleno = 2120 (0x848), region = 68 }
  0x34   : > { %3952 = dma.done.wait (%p4651_p1), [#allocation4], 16384   ;;  %p4652_p0 = pmov %p4651_p1 }
  0x35   : > { %v3978_v0 = vmov 2   ;;  %v3979_v1 = vmov 1   ;;  %v424_v2 = vld [vmem:[%s4628_s2] sm:$0xff]  ;;  %v425_v3 = vld [vmem:[%s4628_s2 + $0x8] sm:$0xff]  ;;  %v3687_v4 = vld [vmem:[#allocation3 + $0x104] ss:$8 sps:$4 sm:$0xff]  }
  0x36   : > { %3954 = vsyncadd (%p4652_p0), [#allocation4], 4294950912  ;;  %3661 = vset.pattern.permute.xlu1 %v3978_v0  ;;  %3660 = vset.pattern.permute.xlu0 %v3979_v1  ;;  %v3689_v5 = vld [vmem:[#allocation3 + $0x100] ss:$8 sps:$4 sm:$0xff]   ;;  %v3690_v6 = vld [vmem:[#allocation3 + $0x114] ss:$8 sps:$4 sm:$0xff]  }
  0x37   : > { %464 = vperm.xlu1 %3661, %v424_v2   ;;  %452 = vperm.xlu0 %3660, %v424_v2   ;;  %v3692_v7 = vld [vmem:[#allocation3 + $0x110] ss:$8 sps:$4 sm:$0xff]   ;;  %v3696_v8 = vld [vmem:[#allocation3 + $0x4] ss:$8 sps:$4 sm:$0xff]   ;;  %v3698_v9 = vld [vmem:[#allocation3] ss:$8 sps:$4 sm:$0xff]  }
  0x38   : > { %3146 = vmatprep.subr.bf16.mxu0 %v3687_v4  ;;  %v3693_v10 = vld [vmem:[#allocation3 + $0x124] ss:$8 sps:$4 sm:$0xff]   ;;  %v3695_v11 = vld [vmem:[#allocation3 + $0x120] ss:$8 sps:$4 sm:$0xff]   ;;  %3082 = vmatprep.subr.bf16.mxu1 %v3696_v8  ;;  %v3702_v12 = vld [vmem:[#allocation3 + $0x14] ss:$8 sps:$4 sm:$0xff]  }
  0x39   : > { %3148 = vmatpush1.bf16.msra.mxu0 %v3689_v5  ;;  %3084 = vmatpush1.bf16.msra.mxu1 %v3698_v9  ;;  %v3704_v13 = vld [vmem:[#allocation3 + $0x10] ss:$8 sps:$4 sm:$0xff]   ;;  %v3980_v14 = vmov 3   ;;  %v3981_v15 = vmov 0   ;;  %v3699_v16 = vld [vmem:[#allocation3 + $0x134] ss:$8 sps:$4 sm:$0xff]   ;;  %v437_v9 = vlaneseq }
  0x3a   : > { %3150 = vmatprep.subr.bf16.mxu0 %v3690_v6  ;;  %v3708_v17 = vld [vmem:[#allocation3 + $0x24] ss:$8 sps:$4 sm:$0xff]   ;;  %3086 = vmatprep.subr.bf16.mxu1 %v3702_v12  ;;  %v3701_v18 = vld [vmem:[#allocation3 + $0x130] ss:$8 sps:$4 sm:$0xff]   ;;  %v3710_v19 = vld [vmem:[#allocation3 + $0x20] ss:$8 sps:$4 sm:$0xff]  }
  0x3b   : > { %468 = vperm.xlu1 %3661, %v425_v3   ;;  %456 = vperm.xlu0 %3660, %v425_v3   ;;  %v3705_v20 = vld [vmem:[#allocation3 + $0x144] ss:$8 sps:$4 sm:$0xff]   ;;  %v3714_v21 = vld [vmem:[#allocation3 + $0x34] ss:$8 sps:$4 sm:$0xff]   ;;  %v3707_v22 = vld [vmem:[#allocation3 + $0x140] ss:$8 sps:$4 sm:$0xff]  }
  0x3c   : > { %v3716_v23 = vld [vmem:[#allocation3 + $0x30] ss:$8 sps:$4 sm:$0xff]   ;;  %v3711_v24 = vld [vmem:[#allocation3 + $0x154] ss:$8 sps:$4 sm:$0xff]   ;;  %v3720_v25 = vld [vmem:[#allocation3 + $0x44] ss:$8 sps:$4 sm:$0xff]  }
  0x3d   : > { %3152 = vmatpush1.bf16.msra.mxu0 %v3692_v7  ;;  %3088 = vmatpush1.bf16.msra.mxu1 %v3704_v13  ;;  %v3713_v26 = vld [vmem:[#allocation3 + $0x150] ss:$8 sps:$4 sm:$0xff]   ;;  %v3722_v27 = vld [vmem:[#allocation3 + $0x40] ss:$8 sps:$4 sm:$0xff]   ;;  %v3717_v28 = vld [vmem:[#allocation3 + $0x164] ss:$8 sps:$4 sm:$0xff]  }
  0x3e   : > { %3154 = vmatprep.subr.bf16.mxu0 %v3693_v10  ;;  %3090 = vmatprep.subr.bf16.mxu1 %v3708_v17  ;;  %v3726_v29 = vld [vmem:[#allocation3 + $0x54] ss:$8 sps:$4 sm:$0xff]   ;;  %v3719_v30 = vld [vmem:[#allocation3 + $0x160] ss:$8 sps:$4 sm:$0xff]   ;;  %v3728_v31 = vld [vmem:[#allocation3 + $0x50] ss:$8 sps:$4 sm:$0xff]  }
  0x3f   : > { %3663 = vset.pattern.permute.xlu1 %v3980_v14  ;;  %3662 = vset.pattern.permute.xlu0 %v3981_v15  ;;  %v3723_v32 = vld [vmem:[#allocation3 + $0x174] ss:$8 sps:$4 sm:$0xff]   ;;  %v3732_v33 = vld [vmem:[#allocation3 + $0x64] ss:$8 sps:$4 sm:$0xff]   ;;  %v3725_v34 = vld [vmem:[#allocation3 + $0x170] ss:$8 sps:$4 sm:$0xff]  }
  0x40   : > { %476 = vperm.xlu1 %3663, %v424_v2   ;;  %428 = vperm.xlu0 %3662, %v424_v2   ;;  %v3734_v35 = vld [vmem:[#allocation3 + $0x60] ss:$8 sps:$4 sm:$0xff]   ;;  %v3729_v36 = vld [vmem:[#allocation3 + $0x184] ss:$8 sps:$4 sm:$0xff]   ;;  %v3738_v37 = vld [vmem:[#allocation3 + $0x74] ss:$8 sps:$4 sm:$0xff]  }
  0x41   : > { %3156 = vmatpush1.bf16.msra.mxu0 %v3695_v11  ;;  %3092 = vmatpush1.bf16.msra.mxu1 %v3710_v19  ;;  %v3731_v38 = vld [vmem:[#allocation3 + $0x180] ss:$8 sps:$4 sm:$0xff]   ;;  %v3740_v39 = vld [vmem:[#allocation3 + $0x70] ss:$8 sps:$4 sm:$0xff]   ;;  %v3735_v40 = vld [vmem:[#allocation3 + $0x194] ss:$8 sps:$4 sm:$0xff]  }
  0x42   : > { %3158 = vmatprep.subr.bf16.mxu0 %v3699_v16  ;;  %3094 = vmatprep.subr.bf16.mxu1 %v3714_v21  ;;  %v3744_v41 = vld [vmem:[#allocation3 + $0x84] ss:$8 sps:$4 sm:$0xff]   ;;  %v3737_v42 = vld [vmem:[#allocation3 + $0x190] ss:$8 sps:$4 sm:$0xff]   ;;  %v3746_v43 = vld [vmem:[#allocation3 + $0x80] ss:$8 sps:$4 sm:$0xff]  }
  0x43   : > { %v3741_v44 = vld [vmem:[#allocation3 + $0x1a4] ss:$8 sps:$4 sm:$0xff]   ;;  %v3750_v45 = vld [vmem:[#allocation3 + $0x94] ss:$8 sps:$4 sm:$0xff]   ;;  %v3743_v47 = vld [vmem:[#allocation3 + $0x1a0] ss:$8 sps:$4 sm:$0xff]  }
  0x44   : > { %3664 = vset.pattern.permute.xlu1 %v3981_v15  ;;  %3665 = vset.pattern.permute.xlu0 %v3980_v14  ;;  %v871_v46 = vld [vmem:[%s4629_s3] sm:$0xff]  ;;  %v3756_v50 = vld [vmem:[#allocation3 + $0xa4] ss:$8 sps:$4 sm:$0xff]   ;;  %v872_v51 = vld [vmem:[%s4629_s3 + $0x8] sm:$0xff]  ;;  %p419_p5 = scmp.lt.s32.totalorder %s4077_s25, 1  ;;  %v438_v10 = vshrl.u32 %v437_v9, 7 }
  0x45   : > { %433 = vperm.xlu1 %3664, %v425_v3   ;;  %480 = vperm.xlu0 %3665, %v425_v3   ;;  %v3747_v48 = vld [vmem:[#allocation3 + $0x1b4] ss:$8 sps:$4 sm:$0xff]   ;;  %v3752_v49 = vld [vmem:[#allocation3 + $0x90] ss:$8 sps:$4 sm:$0xff]   ;;  %v3758_v53 = vld [vmem:[#allocation3 + $0xa0] ss:$8 sps:$4 sm:$0xff]  }
  0x46   : > { %3160 = vmatpush1.bf16.msra.mxu0 %v3701_v18  ;;  %3096 = vmatpush1.bf16.msra.mxu1 %v3716_v23  ;;  %v3749_v52 = vld [vmem:[#allocation3 + $0x1b0] ss:$8 sps:$4 sm:$0xff]   ;;  %v3753_v54 = vld [vmem:[#allocation3 + $0x1c4] ss:$8 sps:$4 sm:$0xff]   ;;  %v3762_v55 = vld [vmem:[#allocation3 + $0xb4] ss:$8 sps:$4 sm:$0xff]  }
  0x47   : > { %3162 = vmatprep.subr.bf16.mxu0 %v3705_v20  ;;  %3098 = vmatprep.subr.bf16.mxu1 %v3720_v25  ;;  %v3755_v56 = vld [vmem:[#allocation3 + $0x1c0] ss:$8 sps:$4 sm:$0xff]   ;;  %v3764_v57 = vld [vmem:[#allocation3 + $0xb0] ss:$8 sps:$4 sm:$0xff]   ;;  %v3759_v58 = vld [vmem:[#allocation3 + $0x1d4] ss:$8 sps:$4 sm:$0xff]  }
  0x48   : > { %v3768_v59 = vld [vmem:[#allocation3 + $0xc4] ss:$8 sps:$4 sm:$0xff]   ;;  %v3761_v60 = vld [vmem:[#allocation3 + $0x1d0] ss:$8 sps:$4 sm:$0xff]   ;;  %v3770_v61 = vld [vmem:[#allocation3 + $0xc0] ss:$8 sps:$4 sm:$0xff]  }
  0x49   : > { %3686 = vset.pattern.permute.xlu0 %v3981_v15  ;;  %875 = vperm.xlu1 %3664, %v871_v46   ;;  %v3765_v62 = vld [vmem:[#allocation3 + $0x1e4] ss:$8 sps:$4 sm:$0xff]   ;;  %v3774_v63 = vld [vmem:[#allocation3 + $0xd4] ss:$8 sps:$4 sm:$0xff]   ;;  %v3767_v0 = vld [vmem:[#allocation3 + $0x1e0] ss:$8 sps:$4 sm:$0xff]  }
  0x4a   : > { %3164 = vmatpush1.bf16.msra.mxu0 %v3707_v22  ;;  %3100 = vmatpush1.bf16.msra.mxu1 %v3722_v27  ;;  %v3776_v1 = vld [vmem:[#allocation3 + $0xd0] ss:$8 sps:$4 sm:$0xff]   ;;  %v3771_v2 = vld [vmem:[#allocation3 + $0x1f4] ss:$8 sps:$4 sm:$0xff]   ;;  %v3780_v3 = vld [vmem:[#allocation3 + $0xe4] ss:$8 sps:$4 sm:$0xff]  }
  0x4b   : > { %3166 = vmatprep.subr.bf16.mxu0 %v3711_v24  ;;  %3102 = vmatprep.subr.bf16.mxu1 %v3726_v29  ;;  %v3773_v4 = vld [vmem:[#allocation3 + $0x1f0] ss:$8 sps:$4 sm:$0xff]   ;;  %v3782_v5 = vld [vmem:[#allocation3 + $0xe0] ss:$8 sps:$4 sm:$0xff]   ;;  %v3777_v6 = vld [vmem:[#allocation3 + $0x204] ss:$8 sps:$4 sm:$0xff]  }
  0x4c   : > { %v3786_v7 = vld [vmem:[#allocation3 + $0xf4] ss:$8 sps:$4 sm:$0xff]   ;;  %v3788_v8 = vld [vmem:[#allocation3 + $0xf0] ss:$8 sps:$4 sm:$0xff]   ;;  %s420_s20 = scalar_select %p419_p5, %s4077_s25, 1  ;;  %v439_v11 = vsub.s32 0, %v438_v10 }
  0x4d   : > { %880 = vperm.xlu1 %3664, %v872_v51   ;;  %v443_v12 = vsub.s32 1, %v438_v10  ;;  %v3779_v19 = vld [vmem:[#allocation3 + $0x200] ss:$8 sps:$4 sm:$0xff]   ;;  %v3783_v21 = vld [vmem:[#allocation3 + $0x214] ss:$8 sps:$4 sm:$0xff]   ;;  %vm1271_vm0 = vcmask 523264  }
  0x4e   : > { %3168 = vmatpush1.bf16.msra.mxu0 %v3713_v26  ;;  %3104 = vmatpush1.bf16.msra.mxu1 %v3728_v31  ;;  %s2602_s28 = sshll.u32 %s420_s20, 1  ;;  %v3785_v27 = vld [vmem:[#allocation3 + $0x210] ss:$8 sps:$4 sm:$0xff]   ;;  %v3791_v31 = vld [vmem:[#allocation3 + $0x220] ss:$8 sps:$4 sm:$0xff]   ;;  %s4643_s16 = smov 64   ;;  %vm3338_vm1 = vmpackc.low %vm1271_vm0, %vm1271_vm0 }
  0x4f   : > { %3170 = vmatprep.subr.bf16.mxu0 %v3717_v28  ;;  %3106 = vmatprep.subr.bf16.mxu1 %v3732_v33  ;;  %s422_s30 = scalar_lea.vmem %s4626_s0, %s2602_s28  ;;  %v3789_v28 = vld [vmem:[#allocation3 + $0x224] ss:$8 sps:$4 sm:$0xff]   ;;  %v3804_v46 = vld [vmem:[#allocation3 + $0x274] ss:$8 sps:$4 sm:$0xff]   ;;  %v3812_v51 = vld [vmem:[#allocation3 + $0x290] ss:$8 sps:$4 sm:$0xff]  }
  0x50   : > { %v423_v13 = vld [vmem:[%s422_s30] sm:$0x3]  ;;  %v3839_v9 = vld [vmem:[#allocation3 + $0x320] ss:$8 sps:$4 sm:$0xff]   ;;  %v3840_v10 = vld [vmem:[#allocation3 + $0x334] ss:$8 sps:$4 sm:$0xff]  }
  0x51   : > { %v4156_v14 = vrot.slane %v423_v13, %v439_v11  ;;  %v4158_v15 = vrot.slane %v423_v13, %v443_v12  ;;  %v3842_v11 = vld [vmem:[#allocation3 + $0x330] ss:$8 sps:$4 sm:$0xff]   ;;  %v3843_v12 = vld [vmem:[#allocation3 + $0x344] ss:$8 sps:$4 sm:$0xff]   ;;  %v3845_v13 = vld [vmem:[#allocation3 + $0x340] ss:$8 sps:$4 sm:$0xff]  }
  0x52   : > { %3172 = vmatpush1.bf16.msra.mxu0 %v3719_v30  ;;  %3108 = vmatpush1.bf16.msra.mxu1 %v3734_v35  ;;  %v3792_v35 = vld [vmem:[#allocation3 + $0x234] ss:$8 sps:$4 sm:$0xff]   ;;  %s3983_s28 = smov 16   ;;  %s3984_s26 = smov 32   ;;  %vm1695_vm2 = vcmask 130048   ;;  %vm1704_vm3 = vcmask 261120  }
  0x53   : > { %3174 = vmatprep.subr.bf16.mxu0 %v3723_v32  ;;  %3110 = vmatprep.subr.bf16.mxu1 %v3738_v37  ;;  %s3985_s15 = smov 48   ;;  %vm1713_vm4 = vcmask 392192   ;;  %s4653_s20 = smov 64   ;;  %vm2053_vm5 = vcmask 785408   ;;  %vm3988_vm6 = vmmov 0  }
  0x54   : > { %s3986_s29 = smov 96   ;;  %p4654_p9 = scmp.ne.s32.totalorder %s4646_s13, 0 }
  0x56   : > { %3176 = vmatpush1.bf16.msra.mxu0 %v3725_v34  ;;  %3112 = vmatpush1.bf16.msra.mxu1 %v3740_v39 }
  0x57   : > { %3178 = vmatprep.subr.bf16.mxu0 %v3729_v36  ;;  %3114 = vmatprep.subr.bf16.mxu1 %v3744_v41  ;;  %v3794_v36 = vld [vmem:[#allocation3 + $0x230] ss:$8 sps:$4 sm:$0xff]   ;;  %v3797_v41 = vld [vmem:[#allocation3 + $0x240] ss:$8 sps:$4 sm:$0xff]  }
  0x5a   : > { %3180 = vmatpush1.bf16.msra.mxu0 %v3731_v38  ;;  %3116 = vmatpush1.bf16.msra.mxu1 %v3746_v43  ;;  %v3795_v38 = vld [vmem:[#allocation3 + $0x244] ss:$8 sps:$4 sm:$0xff]   ;;  %v3800_v43 = vld [vmem:[#allocation3 + $0x250] ss:$8 sps:$4 sm:$0xff]  }
  0x5b   : > { %3182 = vmatprep.subr.bf16.mxu0 %v3735_v40  ;;  %3118 = vmatprep.subr.bf16.mxu1 %v3750_v45  ;;  %v3803_v45 = vld [vmem:[#allocation3 + $0x260] ss:$8 sps:$4 sm:$0xff]  }
  0x5e   : > { %3184 = vmatpush1.bf16.msra.mxu0 %v3737_v42  ;;  %3120 = vmatpush1.bf16.msra.mxu1 %v3752_v49  ;;  %v3798_v42 = vld [vmem:[#allocation3 + $0x254] ss:$8 sps:$4 sm:$0xff]   ;;  %v3809_v49 = vld [vmem:[#allocation3 + $0x280] ss:$8 sps:$4 sm:$0xff]  }
  0x5f   : > { %3186 = vmatprep.subr.bf16.mxu0 %v3741_v44  ;;  %3122 = vmatprep.subr.bf16.mxu1 %v3756_v50  ;;  %v3801_v44 = vld [vmem:[#allocation3 + $0x264] ss:$8 sps:$4 sm:$0xff]   ;;  %v3810_v50 = vld [vmem:[#allocation3 + $0x294] ss:$8 sps:$4 sm:$0xff]  }
  0x62   : > { %3188 = vmatpush1.bf16.msra.mxu0 %v3743_v47  ;;  %3124 = vmatpush1.bf16.msra.mxu1 %v3758_v53  ;;  %v3806_v47 = vld [vmem:[#allocation3 + $0x270] ss:$8 sps:$4 sm:$0xff]   ;;  %v3815_v53 = vld [vmem:[#allocation3 + $0x2a0] ss:$8 sps:$4 sm:$0xff]  }
  0x63   : > { %3190 = vmatprep.subr.bf16.mxu0 %v3747_v48  ;;  %3126 = vmatprep.subr.bf16.mxu1 %v3762_v55  ;;  %v3807_v48 = vld [vmem:[#allocation3 + $0x284] ss:$8 sps:$4 sm:$0xff]   ;;  %v3818_v55 = vld [vmem:[#allocation3 + $0x2b0] ss:$8 sps:$4 sm:$0xff]  }
  0x66   : > { %3192 = vmatpush1.bf16.msra.mxu0 %v3749_v52  ;;  %3128 = vmatpush1.bf16.msra.mxu1 %v3764_v57  ;;  %v3813_v52 = vld [vmem:[#allocation3 + $0x2a4] ss:$8 sps:$4 sm:$0xff]   ;;  %v3821_v57 = vld [vmem:[#allocation3 + $0x2c0] ss:$8 sps:$4 sm:$0xff]  }
  0x67   : > { %3194 = vmatprep.subr.bf16.mxu0 %v3753_v54  ;;  %3130 = vmatprep.subr.bf16.mxu1 %v3768_v59  ;;  %v3816_v54 = vld [vmem:[#allocation3 + $0x2b4] ss:$8 sps:$4 sm:$0xff]   ;;  %v3824_v59 = vld [vmem:[#allocation3 + $0x2d0] ss:$8 sps:$4 sm:$0xff]  }
  0x6a   : > { %3196 = vmatpush1.bf16.msra.mxu0 %v3755_v56  ;;  %3132 = vmatpush1.bf16.msra.mxu1 %v3770_v61  ;;  %v3819_v56 = vld [vmem:[#allocation3 + $0x2c4] ss:$8 sps:$4 sm:$0xff]   ;;  %v3827_v61 = vld [vmem:[#allocation3 + $0x2e0] ss:$8 sps:$4 sm:$0xff]  }
  0x6b   : > { %3198 = vmatprep.subr.bf16.mxu0 %v3759_v58  ;;  %3134 = vmatprep.subr.bf16.mxu1 %v3774_v63  ;;  %v3822_v58 = vld [vmem:[#allocation3 + $0x2d4] ss:$8 sps:$4 sm:$0xff]   ;;  %v3830_v63 = vld [vmem:[#allocation3 + $0x2f0] ss:$8 sps:$4 sm:$0xff]  }
  0x6e   : > { %3200 = vmatpush1.bf16.msra.mxu0 %v3761_v60  ;;  %3136 = vmatpush1.bf16.msra.mxu1 %v3776_v1  ;;  %v3825_v60 = vld [vmem:[#allocation3 + $0x2e4] ss:$8 sps:$4 sm:$0xff]  }
  0x6f   : > { %3202 = vmatprep.subr.bf16.mxu0 %v3765_v62  ;;  %3138 = vmatprep.subr.bf16.mxu1 %v3780_v3  ;;  %v3828_v62 = vld [vmem:[#allocation3 + $0x2f4] ss:$8 sps:$4 sm:$0xff]   ;;  %v3833_v3 = vld [vmem:[#allocation3 + $0x300] ss:$8 sps:$4 sm:$0xff]  }
  0x72   : > { %3204 = vmatpush1.bf16.msra.mxu0 %v3767_v0  ;;  %3140 = vmatpush1.bf16.msra.mxu1 %v3782_v5  ;;  %v3831_v0 = vld [vmem:[#allocation3 + $0x304] ss:$8 sps:$4 sm:$0xff]  }
  0x73   : > { %3206 = vmatprep.subr.bf16.mxu0 %v3771_v2  ;;  %3142 = vmatprep.subr.bf16.mxu1 %v3786_v7 }
  0x76   : > { %3208 = vmatpush1.bf16.msra.mxu0 %v3773_v4  ;;  %3144 = vmatpush1.bf16.msra.mxu1 %v3788_v8  ;;  %v3834_v4 = vld [vmem:[#allocation3 + $0x314] ss:$8 sps:$4 sm:$0xff]   ;;  %v3837_v8 = vld [vmem:[#allocation3 + $0x324] ss:$8 sps:$4 sm:$0xff]  }
  0x77   : > { %3210 = vmatprep.subr.bf16.mxu0 %v3777_v6  ;;  %v3836_v6 = vld [vmem:[#allocation3 + $0x310] ss:$8 sps:$4 sm:$0xff]  }
  0xb6   : > { %v453_v16 = vpop.permute.xlu0 %452  ;;  %v4160_v17 = vpop.permute.xlu1 %464 }
  0xb7   : > { %v459_v18 = vmul.f32 %v453_v16, %v4156_v14  ;;  %v460_v20 = vmul.f32 %v453_v16, %v4158_v15  ;;  %v472_v24 = vmul.f32 %v4160_v17, %v4158_v15  ;;  %v471_v1 = vmul.f32 %v4160_v17, %v4156_v14  ;;  %v3846_v16 = vld [vmem:[#allocation3 + $0x354] ss:$8 sps:$4 sm:$0xff]   ;;  %v3848_v17 = vld [vmem:[#allocation3 + $0x350] ss:$8 sps:$4 sm:$0xff]  }
  0xb9   : > { %1024 = vmatprep.mubr.f32.mxu0 %v460_v20  ;;  %v3852_v20 = vld [vmem:[#allocation3 + $0x374] ss:$8 sps:$4 sm:$0xff]  }
  0xba   : > { %v457_v22 = vpop.permute.xlu0 %456  ;;  %1025 = vmatmul.mubr.f32.vlgmr.msra.gmra.mrb[0].mxu0 %v459_v18  ;;  %v4164_v23 = vpop.permute.xlu1 %468  ;;  %v3849_v18 = vld [vmem:[#allocation3 + $0x364] ss:$8 sps:$4 sm:$0xff]  }
  0xbb   : > { %v461_v25 = vmul.f32 %v457_v22, %v4156_v14  ;;  %v462_v26 = vmul.f32 %v457_v22, %v4158_v15  ;;  %3212 = vmatpush1.bf16.msra.mxu0 %v3779_v19  ;;  %v474_v2 = vmul.f32 %v4164_v23, %v4158_v15  ;;  %v473_v7 = vmul.f32 %v4164_v23, %v4156_v14  ;;  %v3851_v19 = vld [vmem:[#allocation3 + $0x360] ss:$8 sps:$4 sm:$0xff]   ;;  %v3855_v22 = vld [vmem:[#allocation3 + $0x384] ss:$8 sps:$4 sm:$0xff]  }
  0xbc   : > { %3214 = vmatprep.subr.bf16.mxu0 %v3783_v21  ;;  %v3854_v21 = vld [vmem:[#allocation3 + $0x370] ss:$8 sps:$4 sm:$0xff]   ;;  %v3857_v23 = vld [vmem:[#allocation3 + $0x380] ss:$8 sps:$4 sm:$0xff]  }
  0xbd   : > { %1030 = vmatprep.mubr.f32.mxu0 %v462_v26  ;;  %v3861_v26 = vld [vmem:[#allocation3 + $0x3a4] ss:$8 sps:$4 sm:$0xff]  }
  0xbe   : > { %1031 = vmatmul.mubr.f32.gmra.mrb[2].mxu0 %v461_v25  ;;  %v3860_v25 = vld [vmem:[#allocation3 + $0x390] ss:$8 sps:$4 sm:$0xff]  }
  0xbf   : > { %3216 = vmatpush1.bf16.msra.mxu0 %v3785_v27  ;;  %v429_v29 = vpop.permute.xlu0 %428  ;;  %v4170_v30 = vpop.permute.xlu1 %476  ;;  %1101 = vmatprep.mubr.f32.mxu0 %v472_v24  ;;  %v3858_v24 = vld [vmem:[#allocation3 + $0x394] ss:$8 sps:$4 sm:$0xff]   ;;  %v3863_v27 = vld [vmem:[#allocation3 + $0x3a0] ss:$8 sps:$4 sm:$0xff]  }
  0xc0   : > { %v447_v32 = vmul.f32 %v4156_v14, %v429_v29  ;;  %v4175_v33 = vmul.f32 %v4170_v30, %v4156_v14  ;;  %3218 = vmatprep.subr.bf16.mxu0 %v3789_v28  ;;  %v448_v34 = vmul.f32 %v4158_v15, %v429_v29  ;;  %v484_v5 = vmul.f32 %v4170_v30, %v4158_v15  ;;  %v3864_v28 = vld [vmem:[#allocation3 + $0x3b4] ss:$8 sps:$4 sm:$0xff]   ;;  %v3866_v29 = vld [vmem:[#allocation3 + $0x3b0] ss:$8 sps:$4 sm:$0xff]   ;;  %v3867_v30 = vld [vmem:[#allocation3 + $0x3c4] ss:$8 sps:$4 sm:$0xff]  }
  0xc2   : > { %947 = vmatprep.mubr.f32.mxu1 %v448_v34  ;;  %v3872_v34 = vld [vmem:[#allocation3 + $0x3d0] ss:$8 sps:$4 sm:$0xff]  }
  0xc3   : > { %3220 = vmatpush1.bf16.msra.mxu0 %v3791_v31  ;;  %948 = vmatmul.mubr.f32.vlgmr.msra.gmra.mrb[0].mxu1 %v447_v32  ;;  %v3869_v31 = vld [vmem:[#allocation3 + $0x3c0] ss:$8 sps:$4 sm:$0xff]   ;;  %v3870_v32 = vld [vmem:[#allocation3 + $0x3d4] ss:$8 sps:$4 sm:$0xff]  }
  0xc4   : > { %v434_v37 = vpop.permute.xlu1 %433  ;;  %3222 = vmatprep.subr.bf16.mxu0 %v3792_v35  ;;  %v3873_v35 = vld [vmem:[#allocation3 + $0x3e4] ss:$8 sps:$4 sm:$0xff]  }
  0xc5   : > { %v449_v39 = vmul.f32 %v4156_v14, %v434_v37  ;;  %v450_v40 = vmul.f32 %v4158_v15, %v434_v37  ;;  %v3876_v37 = vld [vmem:[#allocation3 + $0x3f4] ss:$8 sps:$4 sm:$0xff]  }
  0xc7   : > { %3224 = vmatpush1.bf16.msra.mxu0 %v3794_v36  ;;  %953 = vmatprep.mubr.f32.mxu1 %v450_v40  ;;  %v3875_v36 = vld [vmem:[#allocation3 + $0x3e0] ss:$8 sps:$4 sm:$0xff]  }
  0xc8   : > { %954 = vmatmul.mubr.f32.gmra.mrb[2].mxu1 %v449_v39  ;;  %3226 = vmatprep.subr.bf16.mxu0 %v3795_v38  ;;  %v3878_v38 = vld [vmem:[#allocation3 + $0x3f0] ss:$8 sps:$4 sm:$0xff]   ;;  %v481_v39 = vpop.permute.xlu0 %480 }
  0xc9   : > { %v486_v40 = vmul.f32 %v481_v39, %v4158_v15 }
  0xcb   : > { %3228 = vmatpush1.bf16.msra.mxu0 %v3797_v41  ;;  %v485_v41 = vmul.f32 %v481_v39, %v4156_v14 }
  0xcc   : > { %3230 = vmatprep.subr.bf16.mxu0 %v3798_v42 }
  0xcf   : > { %3232 = vmatpush1.bf16.msra.mxu0 %v3800_v43 }
  0xd0   : > { %3234 = vmatprep.subr.bf16.mxu0 %v3801_v44 }
  0xd3   : > { %3236 = vmatpush1.bf16.msra.mxu0 %v3803_v45 }
  0xd4   : > { %3238 = vmatprep.subr.bf16.mxu0 %v3804_v46  ;;  %v876_v46 = vpop.permute.xlu1 %875 }
  0xd7   : > { %3240 = vmatpush1.bf16.msra.mxu0 %v3806_v47 }
  0xd8   : > { %3242 = vmatprep.subr.bf16.mxu0 %v3807_v48 }
  0xdb   : > { %3244 = vmatpush1.bf16.msra.mxu0 %v3809_v49 }
  0xdc   : > { %3246 = vmatprep.subr.bf16.mxu0 %v3810_v50 }
  0xdf   : > { %3248 = vmatpush1.bf16.msra.mxu0 %v3812_v51 }
  0xe0   : > { %3250 = vmatprep.subr.bf16.mxu0 %v3813_v52  ;;  %v881_v52 = vpop.permute.xlu1 %880 }
  0xe3   : > { %3252 = vmatpush1.bf16.msra.mxu0 %v3815_v53 }
  0xe4   : > { %3254 = vmatprep.subr.bf16.mxu0 %v3816_v54 }
  0xe7   : > { %3256 = vmatpush1.bf16.msra.mxu0 %v3818_v55 }
  0xe8   : > { %3258 = vmatprep.subr.bf16.mxu0 %v3819_v56 }
  0xeb   : > { %3260 = vmatpush1.bf16.msra.mxu0 %v3821_v57 }
  0xec   : > { %3262 = vmatprep.subr.bf16.mxu0 %v3822_v58 }
  0xef   : > { %3264 = vmatpush1.bf16.msra.mxu0 %v3824_v59 }
  0xf0   : > { %3266 = vmatprep.subr.bf16.mxu0 %v3825_v60 }
  0xf3   : > { %3268 = vmatpush1.bf16.msra.mxu0 %v3827_v61 }
  0xf4   : > { %3270 = vmatprep.subr.bf16.mxu0 %v3828_v62  ;;  %v2663_v62 = vld [vmem:[%s4630_s4] sm:$0xff]  }
  0xf7   : > { %3272 = vmatpush1.bf16.msra.mxu0 %v3830_v63  ;;  %v2747_v63 = vld [vmem:[%s4630_s4 + $0x30] sm:$0xff]  }
  0xf8   : > { %3274 = vmatprep.subr.bf16.mxu0 %v3831_v0  ;;  %v2664_v0 = vunpack.c.l.bf16 %v2663_v62 }
  0xfa   : > { %1102 = vmatmul.mubr.f32.vlgmr.msra.gmra.mrb[0].mxu0 %v471_v1  ;;  %v2688_v1 = vunpack.c.l.bf16 %v2747_v63 }
  0xfb   : > { %1107 = vmatprep.mubr.f32.mxu0 %v474_v2  ;;  %3276 = vmatpush1.bf16.msra.mxu0 %v3833_v3 }
  0xfc   : > { %3278 = vmatprep.subr.bf16.mxu0 %v3834_v4  ;;  %2896 = vmatprep.mubr.msk.f32.mxu1 %vm1271_vm0, %v2688_v1  ;;  %v1724_v1 = vld [vmem:[%s4631_s5 + $0x10] sm:$0xff] }
  0xfe   : > { %1108 = vmatmul.mubr.f32.gmra.mrb[2].mxu0 %v473_v7 }
  0xff   : > { %3280 = vmatpush1.bf16.msra.mxu0 %v3836_v6  ;;  %1178 = vmatprep.mubr.f32.mxu0 %v484_v5 }
 0x100   : > { %3282 = vmatprep.subr.bf16.mxu0 %v3837_v8 }
 0x103   : > { %3284 = vmatpush1.bf16.msra.mxu0 %v3839_v9 }
 0x104   : > { %3286 = vmatprep.subr.bf16.mxu0 %v3840_v10  ;;  %v2742_v10 = vld [vmem:[%s4630_s4 + $0x8] sm:$0xff]  }
 0x107   : > { %3288 = vmatpush1.bf16.msra.mxu0 %v3842_v11  ;;  %v2748_v11 = vld [vmem:[%s4630_s4 + $0x38] sm:$0xff]  }
 0x108   : > { %3290 = vmatprep.subr.bf16.mxu0 %v3843_v12  ;;  %v2665_v12 = vunpack.c.h.bf16 %v2663_v62 }
 0x10b   : > { %3292 = vmatpush1.bf16.msra.mxu0 %v3845_v13  ;;  %v2689_v13 = vunpack.c.h.bf16 %v2747_v63 }
 0x10c   : > { %3294 = vmatprep.subr.bf16.mxu0 %v3846_v16  ;;  %v2668_v16 = vunpack.c.l.bf16 %v2742_v10 }
 0x10f   : > { %3296 = vmatpush1.bf16.msra.mxu0 %v3848_v17  ;;  %v2692_v17 = vunpack.c.l.bf16 %v2748_v11 }
 0x110   : > { %3298 = vmatprep.subr.bf16.mxu0 %v3849_v18  ;;  %v2743_v18 = vld [vmem:[%s4630_s4 + $0x10] sm:$0xff]  }
 0x113   : > { %3300 = vmatpush1.bf16.msra.mxu0 %v3851_v19  ;;  %v2749_v19 = vld [vmem:[%s4630_s4 + $0x40] sm:$0xff]  }
 0x114   : > { %3302 = vmatprep.subr.bf16.mxu0 %v3852_v20  ;;  %v2669_v20 = vunpack.c.h.bf16 %v2742_v10  ;;  %v1726_v10 = vld [vmem:[%s4631_s5 + $0x20] sm:$0xff] }
 0x117   : > { %3304 = vmatpush1.bf16.msra.mxu0 %v3854_v21  ;;  %v2693_v21 = vunpack.c.h.bf16 %v2748_v11  ;;  %v1727_v11 = vld [vmem:[%s4631_s5 + $0x28] sm:$0xff] }
 0x118   : > { %3306 = vmatprep.subr.bf16.mxu0 %v3855_v22  ;;  %v2672_v22 = vunpack.c.l.bf16 %v2743_v18 }
 0x11b   : > { %3308 = vmatpush1.bf16.msra.mxu0 %v3857_v23  ;;  %v2696_v23 = vunpack.c.l.bf16 %v2749_v19 }
 0x11c   : > { %3310 = vmatprep.subr.bf16.mxu0 %v3858_v24  ;;  %v2744_v24 = vld [vmem:[%s4630_s4 + $0x18] sm:$0xff]  }
 0x11f   : > { %3312 = vmatpush1.bf16.msra.mxu0 %v3860_v25  ;;  %v2750_v25 = vld [vmem:[%s4630_s4 + $0x48] sm:$0xff]  }
 0x120   : > { %3314 = vmatprep.subr.bf16.mxu0 %v3861_v26  ;;  %v2673_v26 = vunpack.c.h.bf16 %v2743_v18 }
 0x123   : > { %3316 = vmatpush1.bf16.msra.mxu0 %v3863_v27  ;;  %v2697_v27 = vunpack.c.h.bf16 %v2749_v19  ;;  %v1728_v19 = vld [vmem:[%s4631_s5 + $0x30] sm:$0xff] }
 0x124   : > { %3318 = vmatprep.subr.bf16.mxu0 %v3864_v28  ;;  %v2676_v28 = vunpack.c.l.bf16 %v2744_v24 }
 0x127   : > { %3320 = vmatpush1.bf16.msra.mxu0 %v3866_v29  ;;  %v2700_v29 = vunpack.c.l.bf16 %v2750_v25 }
 0x128   : > { %3322 = vmatprep.subr.bf16.mxu0 %v3867_v30  ;;  %v2745_v30 = vld [vmem:[%s4630_s4 + $0x20] sm:$0xff]  }
 0x129   : > { %v2681_v39 = vunpack.c.h.bf16 %v2745_v30 }
 0x12b   : > { %3324 = vmatpush1.bf16.msra.mxu0 %v3869_v31  ;;  %v2751_v31 = vld [vmem:[%s4630_s4 + $0x50] sm:$0xff]  }
 0x12c   : > { %3326 = vmatprep.subr.bf16.mxu0 %v3870_v32  ;;  %v2677_v32 = vunpack.c.h.bf16 %v2744_v24 }
 0x12f   : > { %3328 = vmatpush1.bf16.msra.mxu0 %v3872_v34  ;;  %v2701_v34 = vunpack.c.h.bf16 %v2750_v25 }
 0x130   : > { %3330 = vmatprep.subr.bf16.mxu0 %v3873_v35  ;;  %v2680_v35 = vunpack.c.l.bf16 %v2745_v30 }
 0x133   : > { %3332 = vmatpush1.bf16.msra.mxu0 %v3875_v36  ;;  %v2704_v36 = vunpack.c.l.bf16 %v2751_v31 }
 0x134   : > { %3334 = vmatprep.subr.bf16.mxu0 %v3876_v37  ;;  %v2746_v37 = vld [vmem:[%s4630_s4 + $0x28] sm:$0xff]  }
 0x137   : > { %3336 = vmatpush1.bf16.msra.mxu0 %v3878_v38  ;;  %v2752_v38 = vld [vmem:[%s4630_s4 + $0x58] sm:$0xff]  }
 0x13a   : > { %1179 = vmatmul.mubr.f32.vlgmr.msra.gmra.mrb[0].mxu0 %v4175_v33 }
 0x13b   : > { %1184 = vmatprep.mubr.f32.mxu0 %v486_v40  ;;  %v2705_v40 = vunpack.c.h.bf16 %v2751_v31 }
 0x13e   : > { %1185 = vmatmul.mubr.f32.gmra.mrb[2].mxu0 %v485_v41  ;;  %v2684_v41 = vunpack.c.l.bf16 %v2746_v37 }
 0x13f   : > { %2878 = vmatprep.mubr.msk.f32.mxu0 %vm1271_vm0, %v2664_v0 }
 0x196   : > { %v949_v42 = vpop.f32.mrb[0].mxu1 }
 0x197   : > { %v951_v43 = vpop.f32.mrb[1].mxu1  ;;  %v950_v47 = vadd.f32 %v949_v42, %v876_v46  ;;  %v2708_v42 = vunpack.c.l.bf16 %v2752_v38 }
 0x198   : > { %v952_v48 = vadd.f32 %v951_v43, %v876_v46  ;;  %v2753_v43 = vld [vmem:[%s4630_s4 + $0x60] sm:$0xff]  }
 0x199   : > { %v2712_v46 = vunpack.c.l.bf16 %v2753_v43 }
 0x19b   : > { %v955_v44 = vpop.f32.mrb[2].mxu1 }
 0x19c   : > { %v957_v45 = vpop.f32.mrb[3].mxu1  ;;  %v956_v54 = vadd.f32 %v955_v44, %v881_v52  ;;  %v2685_v44 = vunpack.c.h.bf16 %v2746_v37 }
 0x19d   : > { %v958_v55 = vadd.f32 %v957_v45, %v881_v52  ;;  %v2709_v45 = vunpack.c.h.bf16 %v2752_v38 }
 0x20d   : > { %v1180_v49 = vpop.f32.mrb[0].mxu0 }
 0x20e   : > { %v3446_v50 = vadd.f32 %v1180_v49, %v950_v47  ;;  %v1182_v51 = vpop.f32.mrb[1].mxu0  ;;  %v2754_v47 = vld [vmem:[%s4630_s4 + $0x68] sm:$0xff]  }
 0x20f   : > { %v3448_v53 = vadd.f32 %v1182_v51, %v952_v48  ;;  %v2713_v48 = vunpack.c.h.bf16 %v2753_v43  ;;  %v2716_v49 = vunpack.c.l.bf16 %v2754_v47  ;;  %v2717_v51 = vunpack.c.h.bf16 %v2754_v47 }
 0x210   : > { %v1191_v15 = vmax.f32 %v3446_v50, 0.0  ;;  %v2755_v50 = vld [vmem:[%s4630_s4 + $0x70] sm:$0xff]  }
 0x211   : > { %v1192_v14 = vmax.f32 %v3448_v53, 0.0  ;;  %v1186_v56 = vpop.f32.mrb[2].mxu0  ;;  %v2720_v52 = vunpack.c.l.bf16 %v2755_v50  ;;  %v2756_v53 = vld [vmem:[%s4630_s4 + $0x78] sm:$0xff]  }
 0x212   : > { %v3450_v33 = vadd.f32 %v1186_v56, %v956_v54  ;;  %v1188_v57 = vpop.f32.mrb[3].mxu0  ;;  %v2721_v54 = vunpack.c.h.bf16 %v2755_v50  ;;  %v1723_v56 = vld [vmem:[%s4631_s5 + $0x8] sm:$0xff] }
 0x213   : > { %v1195_v58 = vmax.f32 %v1191_v15, %v1192_v14  ;;  %v3452_v59 = vadd.f32 %v1188_v57, %v958_v55  ;;  %v2724_v15 = vunpack.c.l.bf16 %v2756_v53  ;;  %v2725_v55 = vunpack.c.h.bf16 %v2756_v53  ;;  %v1722_v14 = vld [vmem:[%s4631_s5] sm:$0xff] }
 0x214   : > { %v1193_v60 = vmax.f32 %v3450_v33, 0.0  ;;  %v3343_v33 = vpack.c.bf16 %v1723_v56, %v1722_v14 }
 0x215   : > { %v1194_v61 = vmax.f32 %v3452_v59, 0.0 }
 0x217   : > { %v1196_v2 = vmax.f32 %v1193_v60, %v1194_v61 }
 0x219   : > { %v3666_v3 = vpack.i.bf16 %v1196_v2, %v1195_v58 }
 0x21b   : > { %3667 = vrot.lane.b32.xlu0 %v3666_v3, %s4643_s16  ;;  %s2659_s16 = sshll.u32 %s4077_s25, 4  ;;  %s3990_s25 = smov [#allocation6]  }
 0x21c   : > { %s4584_s19 = scalar_lea.hbm %s4638_s12, %s2659_s16  ;;  %s3911_s23 = sshll.u32 %s3990_s25, 4  ;;  %s3912_s23 = int_to_ptr.vmem [resolvable:$false] %s3911_s23 }
 0x21d   : > { %s3913_s30 = scalar_lea.vmem %s3912_s23, 32 }
 0x28d   : > { %v3668_v4 = vpop.permute.xlu0 %3667 }
 0x28e   : > { %v3670_v5 = vunpack.i.h.bf16 %v3668_v4  ;;  %v3669_v6 = vunpack.i.l.bf16 %v3668_v4 }
 0x290   : > { %v1206_v7 = vmax.f32 %v1196_v2, %v3670_v5  ;;  %v1205_v8 = vmax.f32 %v1195_v58, %v3669_v6  ;;  %v1725_v2 = vld [vmem:[%s4631_s5 + $0x18] sm:$0xff] }
 0x291   : > { %v3347_v3 = vpack.c.bf16 %v1725_v2, %v1724_v1 }
 0x292   : > { %v3337_v9 = vpack.c.bf16 %v1206_v7, %v1205_v8 }
 0x294   : > { %3339 = vmatprep.subr.msk.bf16.mxu0 %vm3338_vm1, %v3337_v9  ;;  %3443 = vmatprep.subr.msk.bf16.mxu1 %vm3338_vm1, %v3337_v9 }
 0x295   : > { %3342 = vmatpush3.bf16.xpose.msk.msra.mxu0 %vm3338_vm1, %v3337_v9  ;;  %3444 = vmatpush3.bf16.xpose.msk.msra.mxu1 %vm3338_vm1, %v3337_v9 }
 0x296   : > { %3344 = vmatprep.subr.bf16.mxu1 %v3343_v33 }
 0x29c   : > { %2879 = vmatmul.mubr.msk.f32.vlgmr.msra.gmra.mrb[4].mxu0 %vm1271_vm0, %v2665_v12  ;;  %2897 = vmatmul.mubr.msk.f32.vlgmr.msra.gmra.mrb[4].mxu1 %vm1271_vm0, %v2689_v13 }
 0x29d   : > { %2881 = vmatprep.mubr.msk.f32.mxu0 %vm1271_vm0, %v2668_v16  ;;  %2899 = vmatprep.mubr.msk.f32.mxu1 %vm1271_vm0, %v2692_v17  ;;  %v3351_v16 = vpack.c.bf16 %v1727_v11, %v1726_v10 }
 0x29e   : > { %3346 = vmatpush3.bf16.msra.mxu1 %v3343_v33 }
 0x29f   : > { %3348 = vmatprep.subr.bf16.mxu1 %v3347_v3 }
 0x2a0   : > { %2882 = vmatmul.mubr.msk.f32.gmra.mrb[6].mxu0 %vm1271_vm0, %v2669_v20  ;;  %2900 = vmatmul.mubr.msk.f32.gmra.mrb[6].mxu1 %vm1271_vm0, %v2693_v21  ;;  %v1729_v20 = vld [vmem:[%s4631_s5 + $0x38] sm:$0xff] }
 0x2a1   : > { %2884 = vmatprep.mubr.msk.f32.mxu0 %vm1271_vm0, %v2672_v22  ;;  %2902 = vmatprep.mubr.msk.f32.mxu1 %vm1271_vm0, %v2696_v23  ;;  %v3355_v23 = vpack.c.bf16 %v1729_v20, %v1728_v19 }
 0x2a2   : > { %3350 = vmatpush3.bf16.msra.mxu1 %v3347_v3 }
 0x2a3   : > { %3352 = vmatprep.subr.bf16.mxu1 %v3351_v16 }
 0x2a4   : > { %2885 = vmatmul.mubr.msk.f32.gmra.mrb[8].mxu0 %vm1271_vm0, %v2673_v26  ;;  %2903 = vmatmul.mubr.msk.f32.gmra.mrb[8].mxu1 %vm1271_vm0, %v2697_v27 }
 0x2a5   : > { %2887 = vmatprep.mubr.msk.f32.mxu0 %vm1271_vm0, %v2676_v28  ;;  %2905 = vmatprep.mubr.msk.f32.mxu1 %vm1271_vm0, %v2700_v29 }
 0x2a6   : > { %3354 = vmatpush3.bf16.msra.mxu1 %v3351_v16 }
 0x2a7   : > { %3356 = vmatprep.subr.bf16.mxu1 %v3355_v23 }
 0x2a8   : > { %2888 = vmatmul.mubr.msk.f32.gmra.mrb[10].mxu0 %vm1271_vm0, %v2677_v32  ;;  %2906 = vmatmul.mubr.msk.f32.gmra.mrb[10].mxu1 %vm1271_vm0, %v2701_v34 }
 0x2a9   : > { %2890 = vmatprep.mubr.msk.f32.mxu0 %vm1271_vm0, %v2680_v35  ;;  %2908 = vmatprep.mubr.msk.f32.mxu1 %vm1271_vm0, %v2704_v36 }
 0x2aa   : > { %3358 = vmatpush3.bf16.msra.mxu1 %v3355_v23  ;;  %v2637_v23 = vld [vmem:[%s4632_s6] ss:$0 sm:$0xff] }
 0x2ac   : > { %2891 = vmatmul.mubr.msk.f32.gmra.mrb[12].mxu0 %vm1271_vm0, %v2681_v39  ;;  %2909 = vmatmul.mubr.msk.f32.gmra.mrb[12].mxu1 %vm1271_vm0, %v2705_v40 }
 0x2ad   : > { %2893 = vmatprep.mubr.msk.f32.mxu0 %vm1271_vm0, %v2684_v41  ;;  %2911 = vmatprep.mubr.msk.f32.mxu1 %vm1271_vm0, %v2708_v42 }
 0x2b0   : > { %2894 = vmatmul.mubr.msk.f32.gmra.mrb[14].mxu0 %vm1271_vm0, %v2685_v44  ;;  %2912 = vmatmul.mubr.msk.f32.gmra.mrb[14].mxu1 %vm1271_vm0, %v2709_v45 }
 0x2b1   : > { %2914 = vmatprep.mubr.msk.f32.mxu1 %vm1271_vm0, %v2712_v46 }
 0x2b4   : > { %2915 = vmatmul.mubr.msk.f32.gmra.mrb[16].mxu1 %vm1271_vm0, %v2713_v48 }
 0x2b5   : > { %2917 = vmatprep.mubr.msk.f32.mxu1 %vm1271_vm0, %v2716_v49 }
 0x2b8   : > { %2918 = vmatmul.mubr.msk.f32.gmra.mrb[18].mxu1 %vm1271_vm0, %v2717_v51 }
 0x2b9   : > { %2920 = vmatprep.mubr.msk.f32.mxu1 %vm1271_vm0, %v2720_v52 }
 0x2bc   : > { %2921 = vmatmul.mubr.msk.f32.gmra.mrb[20].mxu1 %vm1271_vm0, %v2721_v54 }
 0x2bd   : > { %2923 = vmatprep.mubr.msk.f32.mxu1 %vm1271_vm0, %v2724_v15 }
 0x2c0   : > { %2924 = vmatmul.mubr.msk.f32.gmra.mrb[22].mxu1 %vm1271_vm0, %v2725_v55 }
 0x36f   : > { %v4280_v57 = vpop.f32.mrb[4].mxu0  ;;  %v2898_v58 = vpop.f32.mrb[4].mxu1 }
 0x370   : > { %1617 = vrot.lane.b32.xlu0 %v2898_v58, %s3983_s28  ;;  %v4283_v59 = vpop.f32.mrb[5].mxu0  ;;  %v1500_v60 = vpop.f32.mrb[5].mxu1 }
 0x371   : > { %1615 = vrot.lane.b32.xlu1 %v1500_v60, %s3983_s28 }
 0x373   : > { %v4286_v61 = vpop.f32.mrb[6].mxu0  ;;  %v2901_v62 = vpop.f32.mrb[6].mxu1 }
 0x374   : > { %1621 = vrot.lane.b32.xlu0 %v2901_v62, %s3983_s28  ;;  %v4289_v63 = vpop.f32.mrb[7].mxu0  ;;  %v1510_v0 = vpop.f32.mrb[7].mxu1 }
 0x375   : > { %1619 = vrot.lane.b32.xlu1 %v1510_v0, %s3983_s28 }
 0x377   : > { %v4298_v4 = vpop.f32.mrb[8].mxu0  ;;  %v2904_v5 = vpop.f32.mrb[8].mxu1 }
 0x378   : > { %1641 = vrot.lane.b32.xlu0 %v2904_v5, %s3984_s26  ;;  %v4301_v6 = vpop.f32.mrb[9].mxu0  ;;  %v1520_v7 = vpop.f32.mrb[9].mxu1 }
 0x379   : > { %1639 = vrot.lane.b32.xlu1 %v1520_v7, %s3984_s26 }
 0x37b   : > { %v4304_v8 = vpop.f32.mrb[10].mxu0  ;;  %v2907_v9 = vpop.f32.mrb[10].mxu1 }
 0x37c   : > { %1645 = vrot.lane.b32.xlu0 %v2907_v9, %s3984_s26  ;;  %v4313_v12 = vpop.f32.mrb[11].mxu0  ;;  %v1530_v13 = vpop.f32.mrb[11].mxu1 }
 0x37d   : > { %1643 = vrot.lane.b32.xlu1 %v1530_v13, %s3984_s26 }
 0x37f   : > { %v2892_v17 = vpop.f32.mrb[12].mxu0  ;;  %v2910_v18 = vpop.f32.mrb[12].mxu1 }
 0x380   : > { %1609 = vrot.lane.b32.xlu0 %v2892_v17, %s3983_s28  ;;  %v1480_v21 = vpop.f32.mrb[13].mxu0  ;;  %v1540_v22 = vpop.f32.mrb[13].mxu1 }
 0x381   : > { %1607 = vrot.lane.b32.xlu1 %v1480_v21, %s3983_s28 }
 0x383   : > { %v2895_v24 = vpop.f32.mrb[14].mxu0  ;;  %v2913_v25 = vpop.f32.mrb[14].mxu1 }
 0x384   : > { %1649 = vrot.lane.b32.xlu0 %v2910_v18, %s3984_s26  ;;  %v1490_v26 = vpop.f32.mrb[15].mxu0  ;;  %v1550_v27 = vpop.f32.mrb[15].mxu1 }
 0x385   : > { %1647 = vrot.lane.b32.xlu1 %v1540_v22, %s3984_s26 }
 0x387   : > { %v2916_v28 = vpop.f32.mrb[16].mxu1 }
 0x388   : > { %1613 = vrot.lane.b32.xlu0 %v2895_v24, %s3983_s28  ;;  %v1560_v29 = vpop.f32.mrb[17].mxu1 }
 0x389   : > { %1611 = vrot.lane.b32.xlu1 %v1490_v26, %s3983_s28 }
 0x38b   : > { %v2919_v30 = vpop.f32.mrb[18].mxu1 }
 0x38c   : > { %1653 = vrot.lane.b32.xlu0 %v2913_v25, %s3984_s26  ;;  %v1570_v31 = vpop.f32.mrb[19].mxu1 }
 0x38d   : > { %1651 = vrot.lane.b32.xlu1 %v1550_v27, %s3984_s26 }
 0x38f   : > { %v2922_v32 = vpop.f32.mrb[20].mxu1 }
 0x390   : > { %1673 = vrot.lane.b32.xlu0 %v2916_v28, %s3985_s15  ;;  %v1580_v34 = vpop.f32.mrb[21].mxu1 }
 0x391   : > { %1671 = vrot.lane.b32.xlu1 %v1560_v29, %s3985_s15 }
 0x393   : > { %v2925_v35 = vpop.f32.mrb[22].mxu1 }
 0x394   : > { %1677 = vrot.lane.b32.xlu0 %v2919_v30, %s3985_s15  ;;  %v1590_v36 = vpop.f32.mrb[23].mxu1 }
 0x395   : > { %1675 = vrot.lane.b32.xlu1 %v1570_v31, %s3985_s15 }
 0x398   : > { %1681 = vrot.lane.b32.xlu0 %v2922_v32, %s3985_s15 }
 0x399   : > { %1679 = vrot.lane.b32.xlu1 %v1580_v34, %s3985_s15 }
 0x39c   : > { %1685 = vrot.lane.b32.xlu0 %v2925_v35, %s3985_s15 }
 0x39d   : > { %1683 = vrot.lane.b32.xlu1 %v1590_v36, %s3985_s15 }
 0x3e2   : > { %v1618_v37 = vpop.permute.xlu0 %1617 }
 0x3e3   : > { %v1616_v38 = vpop.permute.xlu1 %1615  ;;  %v1701_v5 = vsel %vm1695_vm2, %v4298_v4, %v1618_v37 }
 0x3e6   : > { %v1622_v39 = vpop.permute.xlu0 %1621 }
 0x3e7   : > { %v1620_v40 = vpop.permute.xlu1 %1619  ;;  %v1703_v4 = vsel %vm1695_vm2, %v4304_v8, %v1622_v39 }
 0x3ea   : > { %v1642_v41 = vpop.permute.xlu0 %1641 }
 0x3eb   : > { %v1640_v42 = vpop.permute.xlu1 %1639 }
 0x3ee   : > { %v1646_v43 = vpop.permute.xlu0 %1645 }
 0x3ef   : > { %v1644_v44 = vpop.permute.xlu1 %1643 }
 0x3f2   : > { %v1610_v45 = vpop.permute.xlu0 %1609 }
 0x3f3   : > { %v1608_v46 = vpop.permute.xlu1 %1607  ;;  %v1697_v54 = vsel %vm1695_vm2, %v4280_v57, %v1610_v45 }
 0x3f4   : > { %v1696_v53 = vsel %vm1695_vm2, %v4283_v59, %v1608_v46  ;;  %v1706_v33 = vsel %vm1704_vm3, %v1697_v54, %v1642_v41 }
 0x3f5   : > { %v1705_v55 = vsel %vm1704_vm3, %v1696_v53, %v1640_v42 }
 0x3f6   : > { %v1650_v47 = vpop.permute.xlu0 %1649 }
 0x3f7   : > { %v1648_v48 = vpop.permute.xlu1 %1647  ;;  %v1710_v10 = vsel %vm1704_vm3, %v1701_v5, %v1650_v47  ;;  %v2060_v5 = vld [vmem:[%s4634_s8 + $0x20] sm:$0xff] }
 0x3fa   : > { %v1614_v49 = vpop.permute.xlu0 %1613 }
 0x3fb   : > { %v1612_v50 = vpop.permute.xlu1 %1611  ;;  %v1699_v60 = vsel %vm1695_vm2, %v4286_v61, %v1614_v49  ;;  %v1700_v61 = vsel %vm1695_vm2, %v4301_v6, %v1616_v38  ;;  %v1702_v6 = vsel %vm1695_vm2, %v4313_v12, %v1620_v40  ;;  %v2727_v12 = vld [vmem:[%s4633_s7] sm:$0xff]  }
 0x3fc   : > { %v1698_v56 = vsel %vm1695_vm2, %v4289_v63, %v1612_v50  ;;  %v1708_v1 = vsel %vm1704_vm3, %v1699_v60, %v1646_v43  ;;  %v1709_v7 = vsel %vm1704_vm3, %v1700_v61, %v1648_v48  ;;  %v2728_v22 = vunpack.c.l.bf16 %v2727_v12  ;;  %v2759_v60 = vld [vmem:[%s4633_s7 + $0x18] sm:$0xff]  }
 0x3fd   : > { %v1707_v62 = vsel %vm1704_vm3, %v1698_v56, %v1644_v44  ;;  %v2758_v56 = vld [vmem:[%s4633_s7 + $0x10] sm:$0xff]   ;;  %v2059_v61 = vld [vmem:[%s4634_s8 + $0x18] sm:$0xff] }
 0x3fe   : > { %v1654_v51 = vpop.permute.xlu0 %1653 }
 0x3ff   : > { %v1652_v52 = vpop.permute.xlu1 %1651  ;;  %v1712_v19 = vsel %vm1704_vm3, %v1703_v4, %v1654_v51 }
 0x400   : > { %v1711_v17 = vsel %vm1704_vm3, %v1702_v6, %v1652_v52  ;;  %v2064_v6 = vld [vmem:[%s4634_s8 + $0x40] sm:$0xff] }
 0x402   : > { %v1674_v15 = vpop.permute.xlu0 %1673 }
 0x403   : > { %v1672_v14 = vpop.permute.xlu1 %1671  ;;  %v1715_v59 = vsel %vm1713_vm4, %v1706_v33, %v1674_v15  ;;  %v2757_v15 = vld [vmem:[%s4633_s7 + $0x8] sm:$0xff]  }
 0x404   : > { %v1714_v58 = vsel %vm1713_vm4, %v1705_v55, %v1672_v14  ;;  %v2729_v55 = vunpack.c.h.bf16 %v2727_v12  ;;  %v2732_v14 = vunpack.c.l.bf16 %v2757_v15  ;;  %v2733_v33 = vunpack.c.h.bf16 %v2757_v15  ;;  %v2168_v15 = vld [vmem:[%s4636_s10 + $0x10] sm:$0xff] }
 0x405   : > { %2942 = vmatprep.mubr.msk.f32.mxu1 %vm1271_vm0, %v1714_v58  ;;  %v2736_v58 = vunpack.c.l.bf16 %v2758_v56 }
 0x406   : > { %v1678_v57 = vpop.permute.xlu0 %1677  ;;  %2943 = vmatmul.mubr.msk.f32.vlgmr.msra.gmra.mrb[24].mxu1 %vm1271_vm0, %v1715_v59  ;;  %v2737_v59 = vunpack.c.h.bf16 %v2758_v56  ;;  %v2170_v56 = vld [vmem:[%s4636_s10 + $0x20] sm:$0xff] }
 0x407   : > { %v1676_v0 = vpop.permute.xlu1 %1675  ;;  %v1717_v2 = vsel %vm1713_vm4, %v1708_v1, %v1678_v57  ;;  %v2740_v57 = vunpack.c.l.bf16 %v2759_v60  ;;  %v2057_v1 = vld [vmem:[%s4634_s8 + $0x8] sm:$0xff] }
 0x408   : > { %v1716_v63 = vsel %vm1713_vm4, %v1707_v62, %v1676_v0  ;;  %v2741_v62 = vunpack.c.h.bf16 %v2759_v60  ;;  %v2056_v0 = vld [vmem:[%s4634_s8] sm:$0xff]  ;;  %v2172_v60 = vld [vmem:[%s4636_s10 + $0x30] sm:$0xff] }
 0x409   : > { %2945 = vmatprep.mubr.msk.f32.mxu1 %vm1271_vm0, %v1716_v63  ;;  %v2058_v63 = vld [vmem:[%s4634_s8 + $0x10] sm:$0xff] }
 0x40a   : > { %v1682_v3 = vpop.permute.xlu0 %1681  ;;  %2946 = vmatmul.mubr.msk.f32.gmra.mrb[26].mxu1 %vm1271_vm0, %v1717_v2  ;;  %v3363_v2 = vpack.c.bf16 %v2057_v1, %v2056_v0  ;;  %v2654_v0 = vld [vmem:[%s4635_s9] ss:$0 sm:$0xff] }
 0x40b   : > { %v1680_v9 = vpop.permute.xlu1 %1679  ;;  %v1719_v13 = vsel %vm1713_vm4, %v1710_v10, %v1682_v3  ;;  %v3367_v3 = vpack.c.bf16 %v2059_v61, %v2058_v63  ;;  %v2062_v10 = vld [vmem:[%s4634_s8 + $0x30] sm:$0xff] }
 0x40c   : > { %v1718_v11 = vsel %vm1713_vm4, %v1709_v7, %v1680_v9  ;;  %v2061_v7 = vld [vmem:[%s4634_s8 + $0x28] sm:$0xff] }
 0x40d   : > { %2948 = vmatprep.mubr.msk.f32.mxu1 %vm1271_vm0, %v1718_v11  ;;  %v3371_v9 = vpack.c.bf16 %v2061_v7, %v2060_v5  ;;  %v2063_v11 = vld [vmem:[%s4634_s8 + $0x38] sm:$0xff]  ;;  %v2255_v7 = vld [vmem:[%s4636_s10 + $0x40] sm:$0xff] }
 0x40e   : > { %v1686_v16 = vpop.permute.xlu0 %1685  ;;  %2949 = vmatmul.mubr.msk.f32.gmra.mrb[28].mxu1 %vm1271_vm0, %v1719_v13  ;;  %v3375_v13 = vpack.c.bf16 %v2063_v11, %v2062_v10  ;;  %v2256_v11 = vld [vmem:[%s4636_s10 + $0x48] sm:$0xff] }
 0x40f   : > { %v1684_v18 = vpop.permute.xlu1 %1683  ;;  %v1721_v21 = vsel %vm1713_vm4, %v1712_v19, %v1686_v16  ;;  %v2065_v16 = vld [vmem:[%s4634_s8 + $0x48] sm:$0xff] }
 0x410   : > { %v1720_v20 = vsel %vm1713_vm4, %v1711_v17, %v1684_v18  ;;  %v3379_v4 = vpack.c.bf16 %v2065_v16, %v2064_v6  ;;  %v2066_v17 = vld [vmem:[%s4634_s8 + $0x50] sm:$0xff]  ;;  %v2067_v18 = vld [vmem:[%s4634_s8 + $0x58] sm:$0xff] }
 0x411   : > { %2951 = vmatprep.mubr.msk.f32.mxu1 %vm1271_vm0, %v1720_v20  ;;  %v3383_v19 = vpack.c.bf16 %v2067_v18, %v2066_v17  ;;  %v2068_v20 = vld [vmem:[%s4634_s8 + $0x60] sm:$0xff]  ;;  %v3408_v17 = vpack.c.bf16 %v2256_v11, %v2255_v7 }
 0x412   : > { %2952 = vmatmul.mubr.msk.f32.gmra.mrb[30].mxu1 %vm1271_vm0, %v1721_v21  ;;  %v2069_v21 = vld [vmem:[%s4634_s8 + $0x68] sm:$0xff] }
 0x413   : > { %2958 = vmatprep.mubr.msk.f32.mxu1 %vm1695_vm2, %v2728_v22  ;;  %v3387_v12 = vpack.c.bf16 %v2069_v21, %v2068_v20  ;;  %v2258_v20 = vld [vmem:[%s4636_s10 + $0x58] sm:$0xff] }
 0x4d9   : > { %v2944_v8 = vpop.f32.mrb[24].mxu1 }
 0x4da   : > { %v1827_v24 = vpop.f32.mrb[25].mxu1  ;;  %v1833_v25 = vadd.f32 %v2944_v8, %v2637_v23  ;;  %v2070_v8 = vld [vmem:[%s4634_s8 + $0x70] sm:$0xff] }
 0x4db   : > { %v1828_v26 = vadd.f32 %v2637_v23, %v1827_v24 }
 0x4dc   : > { %v1867_v31 = vmax.f32 %v1833_v25, 0.0 }
 0x4dd   : > { %v2947_v27 = vpop.f32.mrb[26].mxu1  ;;  %v1866_v34 = vmax.f32 %v1828_v26, 0.0 }
 0x4de   : > { %v1843_v28 = vadd.f32 %v2947_v27, %v2637_v23  ;;  %v1837_v29 = vpop.f32.mrb[27].mxu1 }
 0x4df   : > { %v1838_v30 = vadd.f32 %v2637_v23, %v1837_v29 }
 0x4e0   : > { %v1869_v32 = vmax.f32 %v1843_v28, 0.0 }
 0x4e1   : > { %v1868_v35 = vmax.f32 %v1838_v30, 0.0  ;;  %v2950_v36 = vpop.f32.mrb[28].mxu1 }
 0x4e2   : > { %v1875_v37 = vmax.f32 %v1867_v31, %v1869_v32  ;;  %v1847_v38 = vpop.f32.mrb[29].mxu1  ;;  %v1853_v40 = vadd.f32 %v2950_v36, %v2637_v23 }
 0x4e3   : > { %v1874_v39 = vmax.f32 %v1866_v34, %v1868_v35  ;;  %v1848_v41 = vadd.f32 %v2637_v23, %v1847_v38 }
 0x4e4   : > { %v1871_v46 = vmax.f32 %v1853_v40, 0.0 }
 0x4e5   : > { %v2953_v42 = vpop.f32.mrb[30].mxu1  ;;  %v1870_v48 = vmax.f32 %v1848_v41, 0.0 }
 0x4e6   : > { %v1863_v43 = vadd.f32 %v2953_v42, %v2637_v23  ;;  %v1857_v44 = vpop.f32.mrb[31].mxu1 }
 0x4e7   : > { %v1858_v45 = vadd.f32 %v2637_v23, %v1857_v44  ;;  %v2071_v23 = vld [vmem:[%s4634_s8 + $0x78] sm:$0xff] }
 0x4e8   : > { %v1873_v47 = vmax.f32 %v1863_v43, 0.0  ;;  %v3391_v25 = vpack.c.bf16 %v2071_v23, %v2070_v8  ;;  %v2261_v23 = vld [vmem:[%s4636_s10 + $0x70] sm:$0xff] }
 0x4e9   : > { %v1872_v49 = vmax.f32 %v1858_v45, 0.0 }
 0x4ea   : > { %v1877_v50 = vmax.f32 %v1871_v46, %v1873_v47 }
 0x4eb   : > { %v1876_v51 = vmax.f32 %v1870_v48, %v1872_v49 }
 0x4ec   : > { %v1879_v52 = vmax.f32 %v1875_v37, %v1877_v50 }
 0x4ed   : > { %v1878_v53 = vmax.f32 %v1874_v39, %v1876_v51  ;;  %v2166_v51 = vld [vmem:[%s4636_s10] sm:$0xff] }
 0x4ef   : > { %v3359_v54 = vpack.c.bf16 %v1879_v52, %v1878_v53  ;;  %v2167_v52 = vld [vmem:[%s4636_s10 + $0x8] sm:$0xff] }
 0x4f0   : > { %v3396_v53 = vpack.c.bf16 %v2167_v52, %v2166_v51  ;;  %v2433_v52 = vld [vmem:[%s4636_s10 + $0xc0] sm:$0xff] }
 0x4f1   : > { %3360 = vmatprep.subr.bf16.mxu1 %v3359_v54 }
 0x4f2   : > { %3362 = vmatpush3.bf16.msra.mxu1 %v3359_v54  ;;  %v3987_v54 = vmov 0.0|0.0  }
 0x4f3   : > { %3364 = vmatprep.subr.bf16.mxu1 %v3363_v2 }
 0x4f5   : > { %2959 = vmatmul.mubr.msk.f32.vlgmr.msra.gmra.mrb[32].mxu1 %vm1695_vm2, %v2729_v55  ;;  %v2169_v55 = vld [vmem:[%s4636_s10 + $0x18] sm:$0xff] }
 0x4f6   : > { %2961 = vmatprep.mubr.msk.f32.mxu1 %vm1695_vm2, %v2732_v14  ;;  %3366 = vmatpush3.bf16.msra.mxu1 %v3363_v2  ;;  %v3399_v14 = vpack.c.bf16 %v2169_v55, %v2168_v15 }
 0x4f7   : > { %3368 = vmatprep.subr.bf16.mxu1 %v3367_v3 }
 0x4f9   : > { %2962 = vmatmul.mubr.msk.f32.gmra.mrb[34].mxu1 %vm1695_vm2, %v2733_v33  ;;  %v2171_v33 = vld [vmem:[%s4636_s10 + $0x28] sm:$0xff] }
 0x4fa   : > { %2964 = vmatprep.mubr.msk.f32.mxu1 %vm1695_vm2, %v2736_v58  ;;  %3370 = vmatpush3.bf16.msra.mxu1 %v3367_v3  ;;  %v3402_v58 = vpack.c.bf16 %v2171_v33, %v2170_v56  ;;  %v2436_v56 = vld [vmem:[%s4636_s10 + $0xd8] sm:$0xff] }
 0x4fb   : > { %3372 = vmatprep.subr.bf16.mxu1 %v3371_v9 }
 0x4fd   : > { %2965 = vmatmul.mubr.msk.f32.gmra.mrb[36].mxu1 %vm1695_vm2, %v2737_v59  ;;  %v2173_v59 = vld [vmem:[%s4636_s10 + $0x38] sm:$0xff] }
 0x4fe   : > { %2967 = vmatprep.mubr.msk.f32.mxu1 %vm1695_vm2, %v2740_v57  ;;  %3374 = vmatpush3.bf16.msra.mxu1 %v3371_v9  ;;  %v3989_v57 = vmov 0.0  }
 0x4ff   : > { %3376 = vmatprep.subr.bf16.mxu1 %v3375_v13 }
 0x501   : > { %2968 = vmatmul.mubr.msk.f32.gmra.mrb[38].mxu1 %vm1695_vm2, %v2741_v62  ;;  %v3405_v62 = vpack.c.bf16 %v2173_v59, %v2172_v60  ;;  %v2438_v60 = vld [vmem:[%s4636_s10 + $0xe8] sm:$0xff] }
 0x502   : > { %3378 = vmatpush3.bf16.msra.mxu1 %v3375_v13 }
 0x503   : > { %3380 = vmatprep.subr.bf16.mxu1 %v3379_v4 }
 0x506   : > { %3382 = vmatpush3.bf16.msra.mxu1 %v3379_v4 }
 0x507   : > { %3384 = vmatprep.subr.bf16.mxu1 %v3383_v19 }
 0x50a   : > { %3386 = vmatpush3.bf16.msra.mxu1 %v3383_v19  ;;  %v2257_v19 = vld [vmem:[%s4636_s10 + $0x50] sm:$0xff] }
 0x50b   : > { %3388 = vmatprep.subr.bf16.mxu1 %v3387_v12  ;;  %v3411_v21 = vpack.c.bf16 %v2258_v20, %v2257_v19 }
 0x50e   : > { %3390 = vmatpush3.bf16.msra.mxu1 %v3387_v12  ;;  %v2259_v12 = vld [vmem:[%s4636_s10 + $0x60] sm:$0xff] }
 0x50f   : > { %3392 = vmatprep.subr.bf16.mxu1 %v3391_v25 }
 0x512   : > { %3394 = vmatpush3.bf16.msra.mxu1 %v3391_v25 }
 0x513   : > { %3395 = vmatprep.subr.bf16.mxu1 %v3987_v54 }
 0x5c8   : > { %v2960_v22 = vpop.f32.mrb[32].mxu1 }
 0x5c9   : > { %v1986_v24 = vpop.f32.mrb[33].mxu1 }
 0x5cc   : > { %v2963_v26 = vpop.f32.mrb[34].mxu1 }
 0x5cd   : > { %v1996_v27 = vpop.f32.mrb[35].mxu1 }
 0x5ce   : > { %v3671_v28 = vpack.i.bf16 %v2963_v26, %v1996_v27 }
 0x5d0   : > { %3672 = vrot.lane.b32.xlu1 %v3671_v28, %s3984_s26  ;;  %v2966_v29 = vpop.f32.mrb[36].mxu1  ;;  %s417_s26 = sand.u32 1, %s3965_s22  }
 0x5d1   : > { %v2006_v30 = vpop.f32.mrb[37].mxu1  ;;  %s418_s18 = scalar_lea.vmem [#allocation6], %s417_s26 }
 0x5d2   : > { %v3676_v31 = vpack.i.bf16 %v2966_v29, %v2006_v30  ;;  %s2529_s15 = sshll.u32 %s418_s18, 4  ;;  %s4586_s15 = int_to_ptr.vmem [resolvable:$true] %s2529_s15 }
 0x5d3   : > { %p3914_p2 = scmp.lt.s32.totalorder %s4586_s15, %s3912_s23 }
 0x5d4   : > { %3677 = vrot.lane.b32.xlu0 %v3676_v31, %s4653_s20  ;;  %v2969_v32 = vpop.f32.mrb[38].mxu1  ;;  %s2517_s20 = scalar_lea.sflag [#allocation5], %s417_s26 }
 0x5d5   : > { %v2016_v34 = vpop.f32.mrb[39].mxu1 }
 0x5d6   : > { %v3681_v35 = vpack.i.bf16 %v2969_v32, %v2016_v34  ;;  %v2344_v32 = vld [vmem:[%s4636_s10 + $0x80] sm:$0xff]  ;;  %v2345_v34 = vld [vmem:[%s4636_s10 + $0x88] sm:$0xff] }
 0x5d8   : > { %3682 = vrot.lane.b32.xlu1 %v3681_v35, %s3986_s29  ;;  %v3420_v35 = vpack.c.bf16 %v2345_v34, %v2344_v32  ;;  %s3907_s29 = scalar_lea.vmem %s4586_s15, 16 }
 0x5d9   : > { %p3908_p6 = scmp.ne.s32.totalorder %s4586_s15, %s3907_s29  ;;  %p3915_p3 = scmp.lt.s32.totalorder %s3913_s30, %s3907_s29 }
 0x5db   : > { %p3909_p10 = pnand %p3908_p6, %p4654_p9  ;;  %p3916_p4 = por %p3915_p3, %p3914_p2 }
 0x5dd   : > { %p3910_p12 = pneg %p3909_p10 }
 0x5df   : > { %p3917_p7 = pnand %p3916_p4, %p3910_p12 }
 0x642   : > { %v3673_v36 = vpop.permute.xlu1 %3672 }
 0x643   : > { %v3675_v38 = vunpack.i.h.bf16 %v3673_v36  ;;  %v3674_v39 = vunpack.i.l.bf16 %v3673_v36 }
 0x645   : > { %v2050_v43 = vsel %vm1704_vm3, %v2960_v22, %v3675_v38  ;;  %v2049_v46 = vsel %vm1704_vm3, %v1986_v24, %v3674_v39  ;;  %v2260_v22 = vld [vmem:[%s4636_s10 + $0x68] sm:$0xff]  ;;  %v2262_v24 = vld [vmem:[%s4636_s10 + $0x78] sm:$0xff] }
 0x646   : > { %v3678_v37 = vpop.permute.xlu0 %3677  ;;  %v3414_v8 = vpack.c.bf16 %v2260_v22, %v2259_v12  ;;  %v3417_v29 = vpack.c.bf16 %v2262_v24, %v2261_v23  ;;  %v2347_v38 = vld [vmem:[%s4636_s10 + $0x98] sm:$0xff] }
 0x647   : > { %v3680_v40 = vunpack.i.h.bf16 %v3678_v37  ;;  %v3679_v41 = vunpack.i.l.bf16 %v3678_v37  ;;  %v2346_v37 = vld [vmem:[%s4636_s10 + $0x90] sm:$0xff] }
 0x648   : > { %v3423_v39 = vpack.c.bf16 %v2347_v38, %v2346_v37 }
 0x649   : > { %v2052_v47 = vsel %vm1271_vm0, %v2050_v43, %v3680_v40  ;;  %v2051_v48 = vsel %vm1271_vm0, %v2049_v46, %v3679_v41  ;;  %v2348_v40 = vld [vmem:[%s4636_s10 + $0xa0] sm:$0xff]  ;;  %v2349_v41 = vld [vmem:[%s4636_s10 + $0xa8] sm:$0xff]  ;;  %v2350_v43 = vld [vmem:[%s4636_s10 + $0xb0] sm:$0xff] }
 0x64a   : > { %v3683_v42 = vpop.permute.xlu1 %3682 }
 0x64b   : > { %v3685_v44 = vunpack.i.h.bf16 %v3683_v42  ;;  %v3684_v45 = vunpack.i.l.bf16 %v3683_v42  ;;  %v3426_v42 = vpack.c.bf16 %v2349_v41, %v2348_v40 }
 0x64d   : > { %v2054_v49 = vsel %vm2053_vm5, %v2051_v48, %v3684_v45  ;;  %v2055_v50 = vsel %vm2053_vm5, %v2052_v47, %v3685_v44  ;;  %v2351_v44 = vld [vmem:[%s4636_s10 + $0xb8] sm:$0xff] }
 0x64e   : > { %3002 = vmatprep.mubr.f32.mxu1 %v2054_v49  ;;  %v3429_v49 = vpack.c.bf16 %v2351_v44, %v2350_v43 }
 0x64f   : > { %3003 = vmatmul.mubr.f32.vlgmr.msra.gmra.mrb[40].mxu1 %v2055_v50 }
 0x650   : > { %3397 = vmatpush3.bf16.msra.mxu1 %v3396_v53  ;;  %3021 = vmatprep.mubr.msk.f32.mxu1 %vm3988_vm6, %v3989_v57  ;;  %v2434_v53 = vld [vmem:[%s4636_s10 + $0xc8] sm:$0xff] }
 0x651   : > { %3398 = vmatprep.subr.bf16.mxu1 %v3987_v54  ;;  %v3432_v15 = vpack.c.bf16 %v2434_v53, %v2433_v52 }
 0x654   : > { %3400 = vmatpush3.bf16.msra.mxu1 %v3399_v14  ;;  %v2435_v14 = vld [vmem:[%s4636_s10 + $0xd0] sm:$0xff] }
 0x655   : > { %3401 = vmatprep.subr.bf16.mxu1 %v3987_v54  ;;  %v3435_v33 = vpack.c.bf16 %v2436_v56, %v2435_v14 }
 0x658   : > { %3403 = vmatpush3.bf16.msra.mxu1 %v3402_v58  ;;  %v2437_v58 = vld [vmem:[%s4636_s10 + $0xe0] sm:$0xff] }
 0x659   : > { %3404 = vmatprep.subr.bf16.mxu1 %v3987_v54  ;;  %v3438_v59 = vpack.c.bf16 %v2438_v60, %v2437_v58 }
 0x65c   : > { %3406 = vmatpush3.bf16.msra.mxu1 %v3405_v62  ;;  %v2439_v62 = vld [vmem:[%s4636_s10 + $0xf0] sm:$0xff] }
 0x65d   : > { %3407 = vmatprep.subr.bf16.mxu1 %v3987_v54 }
 0x722   : > { %v3004_v1 = vpop.f32.mrb[40].mxu1 }
 0x723   : > { %v2151_v63 = vadd.f32 %v3004_v1, %v2654_v0  ;;  %v2145_v2 = vpop.f32.mrb[41].mxu1 }
 0x724   : > { %v2146_v61 = vadd.f32 %v2654_v0, %v2145_v2 }
 0x725   : > { %v2155_v3 = vmax.f32 %v2151_v63, 0.0 }
 0x726   : > { %v2154_v5 = vmax.f32 %v2146_v61, 0.0 }
 0x727   : > { %2157 = vst.msk [vmem:[#allocation2 + $0x8] sm:$0xff] %vm1271_vm0, %v2155_v3 }
 0x728   : > { %2156 = vst.msk [vmem:[#allocation2] sm:$0xff] %vm1271_vm0, %v2154_v5 }
 0x72e   : > { %v2162_v9 = vld [vmem:[#allocation2 + $0x8] sm:$0x1]  ;;  %v2163_v10 = vld [vmem:[#allocation2 + $0xc] sm:$0x1]  ;;  %v2251_v25 = vld [vmem:[#allocation2 + $0x9] sm:$0x1] }
 0x72f   : > { %v2159_v13 = vld [vmem:[#allocation2] sm:$0x1]  ;;  %v2160_v6 = vld [vmem:[#allocation2 + $0x4] sm:$0x1]  ;;  %v2164_v16 = vmax.f32 %v2162_v9, %v2163_v10  ;;  %v2248_v26 = vld [vmem:[#allocation2 + $0x1] sm:$0x1] }
 0x730   : > { %v2161_v4 = vmax.f32 %v2159_v13, %v2160_v6  ;;  %v2249_v27 = vld [vmem:[#allocation2 + $0x5] sm:$0x1]  ;;  %v2252_v28 = vld [vmem:[#allocation2 + $0xd] sm:$0x1]  ;;  %v2337_v45 = vld [vmem:[#allocation2 + $0x2] sm:$0x1] }
 0x731   : > { %v2250_v30 = vmax.f32 %v2248_v26, %v2249_v27  ;;  %v2253_v31 = vmax.f32 %v2251_v25, %v2252_v28  ;;  %v2338_v46 = vld [vmem:[#allocation2 + $0x6] sm:$0x1]  ;;  %v2340_v47 = vld [vmem:[#allocation2 + $0xa] sm:$0x1]  ;;  %v2341_v48 = vld [vmem:[#allocation2 + $0xe] sm:$0x1] }
 0x732   : > { %v2165_v18 = vmax.f32 %v2161_v4, %v2164_v16  ;;  %v2339_v50 = vmax.f32 %v2337_v45, %v2338_v46  ;;  %v2342_v51 = vmax.f32 %v2340_v47, %v2341_v48  ;;  %v2426_v0 = vld [vmem:[#allocation2 + $0x3] sm:$0x1]  ;;  %v2427_v1 = vld [vmem:[#allocation2 + $0x7] sm:$0x1]  ;;  %v2429_v63 = vld [vmem:[#allocation2 + $0xb] sm:$0x1] }
 0x733   : > { %v2254_v36 = vmax.f32 %v2250_v30, %v2253_v31  ;;  %v2430_v2 = vld [vmem:[#allocation2 + $0xf] sm:$0x1]  ;;  %v2428_v3 = vmax.f32 %v2426_v0, %v2427_v1  ;;  %v2158_v9 = vld [vmem:[%s4637_s11] sm:$0x1] }
 0x734   : > { %3022 = vmatmul.mubr.msk.f32.vlgmr.msra.gmra.mrb[42].mxu1 %vm1271_vm0, %v2165_v18  ;;  %v2343_v55 = vmax.f32 %v2339_v50, %v2342_v51  ;;  %v2431_v5 = vmax.f32 %v2429_v63, %v2430_v2 }
 0x735   : > { %3409 = vmatpush3.bf16.msra.mxu1 %v3408_v17  ;;  %3040 = vmatprep.mubr.msk.f32.mxu1 %vm3988_vm6, %v3989_v57 }
 0x736   : > { %3410 = vmatprep.subr.bf16.mxu1 %v3987_v54  ;;  %v2432_v7 = vmax.f32 %v2428_v3, %v2431_v5 }
 0x739   : > { %3412 = vmatpush3.bf16.msra.mxu1 %v3411_v21 }
 0x73a   : > { %3413 = vmatprep.subr.bf16.mxu1 %v3987_v54 }
 0x73d   : > { %3415 = vmatpush3.bf16.msra.mxu1 %v3414_v8 }
 0x73e   : > { %3416 = vmatprep.subr.bf16.mxu1 %v3987_v54 }
 0x741   : > { %3418 = vmatpush3.bf16.msra.mxu1 %v3417_v29 }
 0x742   : > { %3419 = vmatprep.subr.bf16.mxu1 %v3987_v54 }
 0x744   : > { %3041 = vmatmul.mubr.msk.f32.vlgmr.msra.gmra.mrb[42].mxu1 %vm1271_vm0, %v2254_v36 }
 0x745   : > { %3421 = vmatpush3.bf16.msra.mxu1 %v3420_v35  ;;  %3059 = vmatprep.mubr.msk.f32.mxu1 %vm3988_vm6, %v3989_v57 }
 0x746   : > { %3422 = vmatprep.subr.bf16.mxu1 %v3987_v54 }
 0x749   : > { %3424 = vmatpush3.bf16.msra.mxu1 %v3423_v39 }
 0x74a   : > { %3425 = vmatprep.subr.bf16.mxu1 %v3987_v54 }
 0x74d   : > { %3427 = vmatpush3.bf16.msra.mxu1 %v3426_v42 }
 0x74e   : > { %3428 = vmatprep.subr.bf16.mxu1 %v3987_v54 }
 0x751   : > { %3430 = vmatpush3.bf16.msra.mxu1 %v3429_v49 }
 0x752   : > { %3431 = vmatprep.subr.bf16.mxu1 %v3987_v54 }
 0x754   : > { %3060 = vmatmul.mubr.msk.f32.vlgmr.msra.gmra.mrb[42].mxu1 %vm1271_vm0, %v2343_v55 }
 0x755   : > { %3433 = vmatpush3.bf16.msra.mxu1 %v3432_v15  ;;  %3078 = vmatprep.mubr.msk.f32.mxu1 %vm3988_vm6, %v3989_v57  ;;  %v2440_v57 = vld [vmem:[%s4636_s10 + $0xf8] sm:$0xff] }
 0x756   : > { %3434 = vmatprep.subr.bf16.mxu1 %v3987_v54  ;;  %v3441_v61 = vpack.c.bf16 %v2440_v57, %v2439_v62 }
 0x759   : > { %3436 = vmatpush3.bf16.msra.mxu1 %v3435_v33 }
 0x75a   : > { %3437 = vmatprep.subr.bf16.mxu1 %v3987_v54 }
 0x75d   : > { %3439 = vmatpush3.bf16.msra.mxu1 %v3438_v59 }
 0x75e   : > { %3440 = vmatprep.subr.bf16.mxu1 %v3987_v54 }
 0x761   : > { %3442 = vmatpush3.bf16.msra.mxu1 %v3441_v61 }
 0x764   : > { %3079 = vmatmul.mubr.msk.f32.vlgmr.msra.gmra.mrb[42].mxu1 %vm1271_vm0, %v2432_v7 }
 0x837   : > { %v2510_v10 = vpop.f32.mrb[42].mxu1 }
 0x838   : > { %v3453_v11 = vadd.f32 %v2510_v10, %v2158_v9  ;;  %v3080_v13 = vpop.f32.mrb[43].mxu1 }
 0x83a   : > { %2515 = vst [vmem:[%s418_s18] sm:$0x1] %v3453_v11 }
 0x83b   : > { %3920 = shalt.err (!%p3917_p7)
}
 0x83c   : > { %s3921_s26 = scalar_lea.hbm %s4584_s19, 16  ;;  %s3925_s28 = scalar_lea.hbm %s4638_s12, 32 }
 0x83d   : > { %p3922_p8 = scmp.ne.s32.totalorder %s4584_s19, %s3921_s26  ;;  %p3926_p1 = scmp.lt.u32.totalorder %s4584_s19, %s4638_s12 }
 0x83e   : > { %p3927_p0 = scmp.lt.u32.totalorder %s3925_s28, %s3921_s26  ;;  %p3929_p6 = scmp.lt.u32.totalorder %s3921_s26, %s4584_s19 }
 0x83f   : > { %p3923_p11 = pnand %p3922_p8, %p4654_p9 }
 0x840   : > { %p3928_p5 = por %p3927_p0, %p3926_p1 }
 0x841   : > { %p3924_p13 = pneg %p3923_p11 }
 0x842   : > { %p3930_p10 = por %p3929_p6, %p3928_p5 }
 0x844   : > { %p3931_p12 = pnand %p3930_p10, %p3924_p13 }
 0x846   : > { %3934 = shalt.err (!%p3931_p12)
}
 0x847   : > { %3600 = dma.vmem_to_hbm [thread:$0]  (%p4654_p9), %s4586_s15, 16, %s4584_s19, %s2517_s20  }
 0x848 PF: > { %p3612_p2 = scmp.ge.s32.totalorder %s3973_s24, 2  ;;  %s2541_s29 = sand.u32 1, %s3961_s21  }
 0x849   : > { %p4655_p3 = scmp.ne.s32.totalorder %s4647_s14, 0  ;;  %s2542_s23 = scalar_lea.sflag [#allocation5], %s2541_s29 }
 0x84b   : > { %p3607_p4 = pnand %p3612_p2, %p4655_p3 }
 0x84d   : > { %3956 = dma.done.wait (!%p3607_p4), %s2542_s23, 16  }
 0x84e   : > { %3958 = vsyncadd (!%p3607_p4), %s2542_s23, 4294967280  ;;  %s4656_s30 = sld [smem:[#allocation9_spill]]  ;;  %s4657_s23 = sld [smem:[#allocation10_spill]] }
 0x84f   : > { %p23_p7 = scmp.ge.s32.totalorder %s4081_s27, 4   ;;  %s4658_s21 = smov %s3965_s22 }
 0x850   : > { %s4660_s24 = smov %s4081_s27 }
 0x851   :  { %25 = sbr.rel (!%p23_p7) target bundleno = 4 (0x4), region = 108 }
 0x854   : > { %s4659_s22 = smov %s4656_s30 }
 0x858   :  { %2546 = vsyncpa [#allocation4], 1 }
 0x859   :  { %2548 = vsyncpa [#allocation4 + $0x1], 1 }
 0x85a   :  { %2549 = vsyncpa [#allocation5], 1 }
 0x85b   :  { %2551 = vsyncpa [#allocation5 + $0x1], 1 }

</bundles_post_ra>
